<compile_context>
chip_gen: v7x
topology: tpu7x:2x2x1
jax: 0.10.0
libtpu: 0.0.40
codegen_flags: <defaults>
</compile_context>

<pallas_src>
from functools import partial

import jax
import jax.numpy as jnp
from jax import lax
from jax.experimental import pallas as pl
from jax.experimental.pallas import tpu as pltpu


_NEG = -99999999.0  # masking sentinel used by the reference implementation


def _cosface_reference(embedding, targets, margin=0.25, gamma=128.0, loss_weight=1.0):
    """Pure-JAX faithful translation of pairwise_cosface (validation + small-N path)."""
    x = embedding.astype(jnp.float32)
    xn = x / jnp.maximum(jnp.linalg.norm(x, axis=1, keepdims=True), 1e-12)
    dist = xn @ xn.T
    n = dist.shape[0]
    t = targets.reshape(n, 1)
    is_pos = (t == t.T).astype(jnp.float32) - jnp.eye(n, dtype=jnp.float32)
    is_neg = (t != t.T).astype(jnp.float32)
    s_p = dist * is_pos
    s_n = dist * is_neg
    logit_p = -gamma * s_p + _NEG * (1.0 - is_pos)
    logit_n = gamma * (s_n + margin) + _NEG * (1.0 - is_neg)
    lse_p = jax.nn.logsumexp(logit_p, axis=1)
    lse_n = jax.nn.logsumexp(logit_n, axis=1)
    return loss_weight * jnp.mean(jax.nn.softplus(lse_p + lse_n))


def _cosface_tile_kernel(emb_r_ref, emb_c_ref, trow_ref, tcol_ref, vcol_ref,
                         out_ref, m_p, l_p, m_n, l_n, *,
                         tile_r, tile_c, margin, gamma, precision):
    i = pl.program_id(0)              # row-tile index ("parallel", resident)
    j = pl.program_id(1)              # col-tile index ("arbitrary", streamed)
    nj = pl.num_programs(1)

    @pl.when(j == 0)
    def _init():
        m_p[...] = jnp.full_like(m_p, -jnp.inf)
        l_p[...] = jnp.zeros_like(l_p)
        m_n[...] = jnp.full_like(m_n, -jnp.inf)
        l_n[...] = jnp.zeros_like(l_n)

    # Cosine-similarity tile on the MXU: operands are pre-normalized (and pre-cast
    # to bf16 on the fast path) in the wrapper; accumulate in f32.
    # Orientation (Tc, Tr): streamed column samples on sublanes, resident rows on lanes.
    dist = lax.dot_general(
        emb_c_ref[...], emb_r_ref[...],
        dimension_numbers=(((1,), (1,)), ((), ())),
        preferred_element_type=jnp.float32,
        precision=precision)                                        # (Tc, Tr) f32

    # Pair masks — no (T,T) iota generation.
    same = tcol_ref[...] == trow_ref[...]                           # (Tc,1)==(1,Tr) -> (Tc,Tr)
    valid = vcol_ref[...] != 0                                      # (Tc,1) column validity
    c_loc = lax.broadcasted_iota(jnp.int32, (tile_c, 1), 0)
    r_loc = lax.broadcasted_iota(jnp.int32, (1, tile_r), 1)
    not_self = (c_loc + (j * tile_c - i * tile_r)) != r_loc         # global col != global row
    pos = same & not_self & valid
    neg = jnp.logical_not(same) & valid

    neg_inf = jnp.float32(_NEG)
    gd = dist * gamma                                               # gamma*dist once
    logit_p = jnp.where(pos, -gd, neg_inf)
    logit_n = jnp.where(neg, gd + (gamma * margin), neg_inf)        # constant folded

    # Fused online (streaming) logsumexp over the column-sample (sublane) axis.
    mp_new = jnp.maximum(m_p[...], jnp.max(logit_p, axis=0, keepdims=True))
    l_p[...] = (l_p[...] * jnp.exp(m_p[...] - mp_new)
                + jnp.sum(jnp.exp(logit_p - mp_new), axis=0, keepdims=True))
    m_p[...] = mp_new

    mn_new = jnp.maximum(m_n[...], jnp.max(logit_n, axis=0, keepdims=True))
    l_n[...] = (l_n[...] * jnp.exp(m_n[...] - mn_new)
                + jnp.sum(jnp.exp(logit_n - mn_new), axis=0, keepdims=True))
    m_n[...] = mn_new

    @pl.when(j == nj - 1)
    def _finalize():
        # lse_p + lse_n, lane-dense (1, Tr) store.
        out_ref[...] = (m_p[...] + jnp.log(l_p[...])
                        + m_n[...] + jnp.log(l_n[...]))


def _round_up(x, m):
    return (x + m - 1) // m * m


def _pick_tiles(n):
    """(Tr resident-row tile, Tc streamed-column tile). Tr is a multiple of Tc."""
    if n <= 256:
        return 128, 128          # keeps >=2 parallel row tiles for v7x when n > 128
    if n <= 1024:
        return 256, 256
    return 512, 256              # rectangular: halves column re-streaming (v5e/v6e)


def cosface_loss(embedding, targets, margin=0.25, gamma=128.0, loss_weight=1.0,
                 *, matmul_dtype=jnp.bfloat16, use_pallas=None):
    """Pallas implementation of pairwise_cosface(embedding, targets, ...).

    bf16 MXU operands (f32 accumulation) are the default fast path; note gamma=128
    amplifies the ~2^-8 cosine error into ~0.5 logit error (fine for training).
    Pass matmul_dtype=jnp.float32 for a near-bit-faithful forward.
    """
    N, D = embedding.shape

    if use_pallas is None:
        # For tiny batches the fused XLA path beats the pallas_call fixed overhead.
        use_pallas = N >= 512
    if not use_pallas:
        return _cosface_reference(embedding, targets, margin, gamma, loss_weight)

    # ---- wrapper-side prep: normalize ONCE, pre-cast, pad to tile multiples ----
    x = embedding.astype(jnp.float32)
    xn = x * lax.rsqrt(jnp.maximum(jnp.sum(x * x, axis=1, keepdims=True), 1e-24))
    xn = xn.astype(matmul_dtype)

    Tr, Tc = _pick_tiles(N)
    n_pad = _round_up(N, Tr)                 # Tr is a multiple of Tc
    d_pad = _round_up(D, 128)                # lane-dense feature dim (zero pad is exact)
    r = n_pad // Tr
    c = n_pad // Tc

    emb = jnp.pad(xn, ((0, n_pad - N), (0, d_pad - D)))
    tgt = jnp.pad(targets.astype(jnp.int32), (0, n_pad - N))
    t_row = tgt.reshape(1, n_pad)            # lane-dense row targets
    t_col = tgt.reshape(n_pad, 1)            # sublane-oriented column targets
    v_col = (jnp.arange(n_pad, dtype=jnp.int32) < N).astype(jnp.int32).reshape(n_pad, 1)

    precision = (lax.Precision.HIGHEST
                 if jnp.dtype(matmul_dtype) == jnp.dtype(jnp.float32)
                 else lax.Precision.DEFAULT)

    kernel = partial(
        _cosface_tile_kernel,
        tile_r=Tr, tile_c=Tc,
        margin=float(margin), gamma=float(gamma),
        precision=precision,
    )

    esize = jnp.dtype(matmul_dtype).itemsize
    # VMEM accounting with physical sublane/lane padding of small blocks.
    vmem_need = (
        2 * Tr * d_pad * esize        # row embedding tile (double-buffered)
        + 2 * Tc * d_pad * esize      # streamed column embedding tile
        + 2 * 8 * Tr * 4              # (1,Tr) row-target blocks -> padded to (8,Tr)
        + 4 * Tc * 128 * 4            # (Tc,1) col targets + validity -> padded to (Tc,128)
        + 2 * 8 * Tr * 4              # (1,Tr) output block
        + 4 * 8 * Tr * 4              # online-LSE scratch
        + 8 * Tc * Tr * 4             # headroom for (Tc,Tr) f32/bool temporaries
    )
    # Keep under the v7x 64 MiB physical ceiling with margin.
    vmem_limit = int(min(max(2 * vmem_need, 16 << 20), 48 << 20))

    cost = pl.CostEstimate(
        flops=2 * n_pad * n_pad * d_pad,
        transcendentals=2 * n_pad * n_pad,
        bytes_accessed=(r * n_pad * d_pad * esize    # streamed column tiles (re-fetched per row tile)
                        + n_pad * d_pad * esize      # resident row tiles
                        + 12 * n_pad + 4 * n_pad),
    )

    s = pl.pallas_call(
        kernel,
        out_shape=jax.ShapeDtypeStruct((1, n_pad), jnp.float32),
        grid_spec=pltpu.PrefetchScalarGridSpec(
            num_scalar_prefetch=0,
            grid=(r, c),
            in_specs=[
                pl.BlockSpec((Tr, d_pad), lambda i, j: (i, 0)),   # resident row embedding tile
                pl.BlockSpec((Tc, d_pad), lambda i, j: (j, 0)),   # streamed column embedding tile
                pl.BlockSpec((1, Tr), lambda i, j: (0, i)),       # row targets (lane-dense)
                pl.BlockSpec((Tc, 1), lambda i, j: (j, 0)),       # column targets
                pl.BlockSpec((Tc, 1), lambda i, j: (j, 0)),       # column validity
            ],
            out_specs=pl.BlockSpec((1, Tr), lambda i, j: (0, i)),
            scratch_shapes=[pltpu.VMEM((1, Tr), jnp.float32)] * 4,
        ),
        compiler_params=pltpu.CompilerParams(
            dimension_semantics=("parallel", "arbitrary"),
            vmem_limit_bytes=vmem_limit,
        ),
        cost_estimate=cost,
    )(emb, emb, t_row, t_col, v_col)

    s = s.reshape(n_pad)[:N]               # drop padded rows
    loss = jnp.mean(jax.nn.softplus(s))    # O(N) epilogue, negligible
    return jnp.float32(loss_weight) * loss


if __name__ == "__main__":
    key = jax.random.PRNGKey(0)
    k1, k2, k3, k4 = jax.random.split(key, 4)

    # Small, deliberately non-tile-multiple shapes: exercises row/feature padding,
    # the column-validity mask and the multi-tile streaming-logsumexp path (2x2 grid).
    N, D = 200, 64
    embedding = jax.random.normal(k1, (N, D), dtype=jnp.float32)
    targets = jax.random.randint(k2, (N,), 0, 8, dtype=jnp.int32)

    ref = _cosface_reference(embedding, targets, margin=0.25, gamma=128.0,
                             loss_weight=1.0)

    # f32 MXU operands (validation path): tight match against the reference.
    loss_f32 = cosface_loss(embedding, targets, margin=0.25, gamma=128.0,
                            loss_weight=1.0, use_pallas=True,
                            matmul_dtype=jnp.float32)
    jax.block_until_ready(loss_f32)
    assert jnp.allclose(loss_f32, ref, rtol=1e-2, atol=0.5), (loss_f32, ref)

    # bf16 MXU operands with f32 accumulation: the default fast path.
    loss_bf16 = cosface_loss(embedding, targets, margin=0.25, gamma=128.0,
                             loss_weight=1.0, use_pallas=True)
    jax.block_until_ready(loss_bf16)
    assert jnp.allclose(loss_bf16, ref, rtol=5e-2, atol=2.0), (loss_bf16, ref)

    # Medium case: 256-tiles, 3x3 grid, feature dim padded 96 -> 128.
    N2, D2 = 600, 96
    emb2 = jax.random.normal(k3, (N2, D2), dtype=jnp.float32)
    tgt2 = jax.random.randint(k4, (N2,), 0, 16, dtype=jnp.int32)
    ref2 = _cosface_reference(emb2, tgt2)
    loss2 = cosface_loss(emb2, tgt2, use_pallas=True)
    jax.block_until_ready(loss2)
    assert jnp.allclose(loss2, ref2, rtol=5e-2, atol=2.0), (loss2, ref2)

    print("KERNEL_OK")
</pallas_src>

<mosaic_0001>
module attributes {stable_mosaic.version = 11 : i64} {
  func.func @_cosface_tile_kernel(%arg0: i32, %arg1: i32, %arg2: memref<128x128xf32, #tpu.memory_space<vmem>>, %arg3: memref<128x128xf32, #tpu.memory_space<vmem>>, %arg4: memref<1x128xi32, #tpu.memory_space<vmem>>, %arg5: memref<128x1xi32, #tpu.memory_space<vmem>>, %arg6: memref<128x1xi32, #tpu.memory_space<vmem>>, %arg7: memref<1x128xf32, #tpu.memory_space<vmem>>, %arg8: memref<1x128xf32, #tpu.memory_space<vmem>>, %arg9: memref<1x128xf32, #tpu.memory_space<vmem>>, %arg10: memref<1x128xf32, #tpu.memory_space<vmem>>, %arg11: memref<1x128xf32, #tpu.memory_space<vmem>>) attributes {dimension_semantics = [#tpu.dimension_semantics<parallel>, #tpu.dimension_semantics<arbitrary>], iteration_bounds = array<i64: 2, 2>, scalar_prefetch = 0 : i64, scratch_operands = 4 : i64, tpu.core_type = #tpu.core_type<tc>, window_params = [{transform_indices = @transform_0, window_bounds = array<i64: 128, 128>}, {transform_indices = @transform_1, window_bounds = array<i64: 128, 128>}, {transform_indices = @transform_2, window_bounds = array<i64: 1, 128>}, {transform_indices = @transform_3, window_bounds = array<i64: 128, 1>}, {transform_indices = @transform_4, window_bounds = array<i64: 128, 1>}, {transform_indices = @transform_5, window_bounds = array<i64: 1, 128>}]} {
    %c0_i32 = arith.constant 0 : i32
    %0 = arith.cmpi eq, %arg1, %c0_i32 : i32
    %1 = arith.extui %0 : i1 to i32
    %c0_i32_0 = arith.constant 0 : i32
    %2 = arith.cmpi ne, %1, %c0_i32_0 : i32
    scf.if %2 {
      %cst_43 = arith.constant 0xFF800000 : f32
      %77 = vector.broadcast %cst_43 : f32 to vector<1x128xf32>
      %c0_44 = arith.constant 0 : index
      %c0_45 = arith.constant 0 : index
      %78 = vector.load %arg8[%c0_44, %c0_45] : memref<1x128xf32, #tpu.memory_space<vmem>>, vector<1x128xf32>
      tpu.vector_store %arg8[%c0_44, %c0_45], %77 {strides = array<i32>} : memref<1x128xf32, #tpu.memory_space<vmem>>, vector<1x128xf32>,
      %cst_46 = arith.constant 0.000000e+00 : f32
      %79 = vector.broadcast %cst_46 : f32 to vector<1x128xf32>
      %c0_47 = arith.constant 0 : index
      %c0_48 = arith.constant 0 : index
      %80 = vector.load %arg9[%c0_47, %c0_48] : memref<1x128xf32, #tpu.memory_space<vmem>>, vector<1x128xf32>
      tpu.vector_store %arg9[%c0_47, %c0_48], %79 {strides = array<i32>} : memref<1x128xf32, #tpu.memory_space<vmem>>, vector<1x128xf32>,
      %cst_49 = arith.constant 0xFF800000 : f32
      %81 = vector.broadcast %cst_49 : f32 to vector<1x128xf32>
      %c0_50 = arith.constant 0 : index
      %c0_51 = arith.constant 0 : index
      %82 = vector.load %arg10[%c0_50, %c0_51] : memref<1x128xf32, #tpu.memory_space<vmem>>, vector<1x128xf32>
      tpu.vector_store %arg10[%c0_50, %c0_51], %81 {strides = array<i32>} : memref<1x128xf32, #tpu.memory_space<vmem>>, vector<1x128xf32>,
      %cst_52 = arith.constant 0.000000e+00 : f32
      %83 = vector.broadcast %cst_52 : f32 to vector<1x128xf32>
      %c0_53 = arith.constant 0 : index
      %c0_54 = arith.constant 0 : index
      %84 = vector.load %arg11[%c0_53, %c0_54] : memref<1x128xf32, #tpu.memory_space<vmem>>, vector<1x128xf32>
      tpu.vector_store %arg11[%c0_53, %c0_54], %83 {strides = array<i32>} : memref<1x128xf32, #tpu.memory_space<vmem>>, vector<1x128xf32>,
    } else {
    }
    %c0 = arith.constant 0 : index
    %c0_1 = arith.constant 0 : index
    %3 = vector.load %arg3[%c0, %c0_1] : memref<128x128xf32, #tpu.memory_space<vmem>>, vector<128x128xf32>
    %c0_2 = arith.constant 0 : index
    %c0_3 = arith.constant 0 : index
    %4 = vector.load %arg2[%c0_2, %c0_3] : memref<128x128xf32, #tpu.memory_space<vmem>>, vector<128x128xf32>
    %cst = arith.constant dense<0.000000e+00> : vector<128x128xf32>
    %5 = tpu.matmul %3, %4, %cst {dimension_numbers = #tpu.dot_dimension_numbers<[1], [1], [0], [0], [0, 0, 1, 0], [], []>, precision = #tpu.contract_precision<fp32>} : vector<128x128xf32>, vector<128x128xf32>, vector<128x128xf32> -> vector<128x128xf32>
    %c0_4 = arith.constant 0 : index
    %c0_5 = arith.constant 0 : index
    %6 = vector.load %arg5[%c0_4, %c0_5] : memref<128x1xi32, #tpu.memory_space<vmem>>, vector<128x1xi32>
    %c0_6 = arith.constant 0 : index
    %c0_7 = arith.constant 0 : index
    %7 = vector.load %arg4[%c0_6, %c0_7] : memref<1x128xi32, #tpu.memory_space<vmem>>, vector<1x128xi32>
    %8 = vector.broadcast %6 : vector<128x1xi32> to vector<128x128xi32>
    %9 = vector.broadcast %7 : vector<1x128xi32> to vector<128x128xi32>
    %10 = arith.cmpi eq, %8, %9 : vector<128x128xi32>
    %c0_8 = arith.constant 0 : index
    %c0_9 = arith.constant 0 : index
    %11 = vector.load %arg6[%c0_8, %c0_9] : memref<128x1xi32, #tpu.memory_space<vmem>>, vector<128x1xi32>
    %c0_i32_10 = arith.constant 0 : i32
    %12 = vector.broadcast %c0_i32_10 : i32 to vector<128x1xi32>
    %13 = arith.cmpi ne, %11, %12 : vector<128x1xi32>
    %14 = tpu.iota {dimensions = array<i32: 0>} : vector<128x1xi32>
    %15 = tpu.iota {dimensions = array<i32: 1>} : vector<1x128xi32>
    %c128_i32 = arith.constant 128 : i32
    %16 = arith.muli %arg1, %c128_i32 : i32
    %c128_i32_11 = arith.constant 128 : i32
    %17 = arith.muli %arg0, %c128_i32_11 : i32
    %18 = arith.subi %16, %17 : i32
    %19 = vector.broadcast %18 : i32 to vector<128x1xi32>
    %20 = arith.addi %14, %19 : vector<128x1xi32>
    %21 = vector.broadcast %20 : vector<128x1xi32> to vector<128x128xi32>
    %22 = vector.broadcast %15 : vector<1x128xi32> to vector<128x128xi32>
    %23 = arith.cmpi ne, %21, %22 : vector<128x128xi32>
    %24 = arith.andi %10, %23 : vector<128x128xi1>
    %25 = vector.broadcast %13 : vector<128x1xi1> to vector<128x128xi1>
    %26 = arith.andi %24, %25 : vector<128x128xi1>
    %cst_12 = arith.constant dense<true> : vector<128x128xi1>
    %27 = arith.xori %10, %cst_12 : vector<128x128xi1>
    %28 = vector.broadcast %13 : vector<128x1xi1> to vector<128x128xi1>
    %29 = arith.andi %27, %28 : vector<128x128xi1>
    %cst_13 = arith.constant 1.280000e+02 : f32
    %30 = vector.broadcast %cst_13 : f32 to vector<128x128xf32>
    %31 = arith.mulf %5, %30 : vector<128x128xf32>
    %cst_14 = arith.constant 0.000000e+00 : f32
    %32 = vector.broadcast %cst_14 : f32 to vector<128x128xf32>
    %33 = arith.subf %32, %31 : vector<128x128xf32>
    %cst_15 = arith.constant -1.000000e+08 : f32
    %34 = vector.broadcast %cst_15 : f32 to vector<128x128xf32>
    %35 = arith.select %26, %33, %34 : vector<128x128xi1>, vector<128x128xf32>
    %cst_16 = arith.constant 3.200000e+01 : f32
    %36 = vector.broadcast %cst_16 : f32 to vector<128x128xf32>
    %37 = arith.addf %31, %36 : vector<128x128xf32>
    %cst_17 = arith.constant -1.000000e+08 : f32
    %38 = vector.broadcast %cst_17 : f32 to vector<128x128xf32>
    %39 = arith.select %29, %37, %38 : vector<128x128xi1>, vector<128x128xf32>
    %c0_18 = arith.constant 0 : index
    %c0_19 = arith.constant 0 : index
    %40 = vector.load %arg8[%c0_18, %c0_19] : memref<1x128xf32, #tpu.memory_space<vmem>>, vector<1x128xf32>
    %cst_20 = arith.constant dense<0xFF800000> : vector<128xf32>
    %41 = vector.multi_reduction <maximumf>, %35, %cst_20 [0] : vector<128x128xf32> to vector<128xf32>
    %42 = vector.shape_cast %41 : vector<128xf32> to vector<1x128xf32>
    %43 = arith.maximumf %40, %42 : vector<1x128xf32>
    %c0_21 = arith.constant 0 : index
    %c0_22 = arith.constant 0 : index
    %44 = vector.load %arg9[%c0_21, %c0_22] : memref<1x128xf32, #tpu.memory_space<vmem>>, vector<1x128xf32>
    %c0_23 = arith.constant 0 : index
    %c0_24 = arith.constant 0 : index
    %45 = vector.load %arg8[%c0_23, %c0_24] : memref<1x128xf32, #tpu.memory_space<vmem>>, vector<1x128xf32>
    %46 = arith.subf %45, %43 : vector<1x128xf32>
    %47 = math.exp %46 : vector<1x128xf32>
    %48 = arith.mulf %44, %47 : vector<1x128xf32>
    %49 = vector.broadcast %43 : vector<1x128xf32> to vector<128x128xf32>
    %50 = arith.subf %35, %49 : vector<128x128xf32>
    %51 = math.exp %50 : vector<128x128xf32>
    %cst_25 = arith.constant dense<0.000000e+00> : vector<128xf32>
    %52 = vector.multi_reduction <add>, %51, %cst_25 [0] : vector<128x128xf32> to vector<128xf32>
    %53 = vector.shape_cast %52 : vector<128xf32> to vector<1x128xf32>
    %54 = arith.addf %48, %53 : vector<1x128xf32>
    %c0_26 = arith.constant 0 : index
    %c0_27 = arith.constant 0 : index
    %55 = vector.load %arg9[%c0_26, %c0_27] : memref<1x128xf32, #tpu.memory_space<vmem>>, vector<1x128xf32>
    tpu.vector_store %arg9[%c0_26, %c0_27], %54 {strides = array<i32>} : memref<1x128xf32, #tpu.memory_space<vmem>>, vector<1x128xf32>,
    %c0_28 = arith.constant 0 : index
    %c0_29 = arith.constant 0 : index
    %56 = vector.load %arg8[%c0_28, %c0_29] : memref<1x128xf32, #tpu.memory_space<vmem>>, vector<1x128xf32>
    tpu.vector_store %arg8[%c0_28, %c0_29], %43 {strides = array<i32>} : memref<1x128xf32, #tpu.memory_space<vmem>>, vector<1x128xf32>,
    %c0_30 = arith.constant 0 : index
    %c0_31 = arith.constant 0 : index
    %57 = vector.load %arg10[%c0_30, %c0_31] : memref<1x128xf32, #tpu.memory_space<vmem>>, vector<1x128xf32>
    %cst_32 = arith.constant dense<0xFF800000> : vector<128xf32>
    %58 = vector.multi_reduction <maximumf>, %39, %cst_32 [0] : vector<128x128xf32> to vector<128xf32>
    %59 = vector.shape_cast %58 : vector<128xf32> to vector<1x128xf32>
    %60 = arith.maximumf %57, %59 : vector<1x128xf32>
    %c0_33 = arith.constant 0 : index
    %c0_34 = arith.constant 0 : index
    %61 = vector.load %arg11[%c0_33, %c0_34] : memref<1x128xf32, #tpu.memory_space<vmem>>, vector<1x128xf32>
    %c0_35 = arith.constant 0 : index
    %c0_36 = arith.constant 0 : index
    %62 = vector.load %arg10[%c0_35, %c0_36] : memref<1x128xf32, #tpu.memory_space<vmem>>, vector<1x128xf32>
    %63 = arith.subf %62, %60 : vector<1x128xf32>
    %64 = math.exp %63 : vector<1x128xf32>
    %65 = arith.mulf %61, %64 : vector<1x128xf32>
    %66 = vector.broadcast %60 : vector<1x128xf32> to vector<128x128xf32>
    %67 = arith.subf %39, %66 : vector<128x128xf32>
    %68 = math.exp %67 : vector<128x128xf32>
    %cst_37 = arith.constant dense<0.000000e+00> : vector<128xf32>
    %69 = vector.multi_reduction <add>, %68, %cst_37 [0] : vector<128x128xf32> to vector<128xf32>
    %70 = vector.shape_cast %69 : vector<128xf32> to vector<1x128xf32>
    %71 = arith.addf %65, %70 : vector<1x128xf32>
    %c0_38 = arith.constant 0 : index
    %c0_39 = arith.constant 0 : index
    %72 = vector.load %arg11[%c0_38, %c0_39] : memref<1x128xf32, #tpu.memory_space<vmem>>, vector<1x128xf32>
    tpu.vector_store %arg11[%c0_38, %c0_39], %71 {strides = array<i32>} : memref<1x128xf32, #tpu.memory_space<vmem>>, vector<1x128xf32>,
    %c0_40 = arith.constant 0 : index
    %c0_41 = arith.constant 0 : index
    %73 = vector.load %arg10[%c0_40, %c0_41] : memref<1x128xf32, #tpu.memory_space<vmem>>, vector<1x128xf32>
    tpu.vector_store %arg10[%c0_40, %c0_41], %60 {strides = array<i32>} : memref<1x128xf32, #tpu.memory_space<vmem>>, vector<1x128xf32>,
    %c1_i32 = arith.constant 1 : i32
    %74 = arith.cmpi eq, %arg1, %c1_i32 : i32
    %75 = arith.extui %74 : i1 to i32
    %c0_i32_42 = arith.constant 0 : i32
    %76 = arith.cmpi ne, %75, %c0_i32_42 : i32
    scf.if %76 {
      %c0_43 = arith.constant 0 : index
      %c0_44 = arith.constant 0 : index
      %77 = vector.load %arg8[%c0_43, %c0_44] : memref<1x128xf32, #tpu.memory_space<vmem>>, vector<1x128xf32>
      %c0_45 = arith.constant 0 : index
      %c0_46 = arith.constant 0 : index
      %78 = vector.load %arg9[%c0_45, %c0_46] : memref<1x128xf32, #tpu.memory_space<vmem>>, vector<1x128xf32>
      %79 = math.log %78 : vector<1x128xf32>
      %80 = arith.addf %77, %79 : vector<1x128xf32>
      %c0_47 = arith.constant 0 : index
      %c0_48 = arith.constant 0 : index
      %81 = vector.load %arg10[%c0_47, %c0_48] : memref<1x128xf32, #tpu.memory_space<vmem>>, vector<1x128xf32>
      %82 = arith.addf %80, %81 : vector<1x128xf32>
      %c0_49 = arith.constant 0 : index
      %c0_50 = arith.constant 0 : index
      %83 = vector.load %arg11[%c0_49, %c0_50] : memref<1x128xf32, #tpu.memory_space<vmem>>, vector<1x128xf32>
      %84 = math.log %83 : vector<1x128xf32>
      %85 = arith.addf %82, %84 : vector<1x128xf32>
      %c0_51 = arith.constant 0 : index
      %c0_52 = arith.constant 0 : index
      %86 = vector.load %arg7[%c0_51, %c0_52] : memref<1x128xf32, #tpu.memory_space<vmem>>, vector<1x128xf32>
      tpu.vector_store %arg7[%c0_51, %c0_52], %85 {strides = array<i32>} : memref<1x128xf32, #tpu.memory_space<vmem>>, vector<1x128xf32>,
    } else {
    }
    return
  }
  func.func @transform_0(%arg0: i32, %arg1: i32) -> (i32, i32) {
    %c0_i32 = arith.constant 0 : i32
    %c0_i32_0 = arith.constant 0 : i32
    return %arg0, %c0_i32 : i32, i32
  }
  func.func @transform_1(%arg0: i32, %arg1: i32) -> (i32, i32) {
    %c0_i32 = arith.constant 0 : i32
    %c0_i32_0 = arith.constant 0 : i32
    return %arg1, %c0_i32 : i32, i32
  }
  func.func @transform_2(%arg0: i32, %arg1: i32) -> (i32, i32) {
    %c0_i32 = arith.constant 0 : i32
    %c0_i32_0 = arith.constant 0 : i32
    return %c0_i32, %arg0 : i32, i32
  }
  func.func @transform_3(%arg0: i32, %arg1: i32) -> (i32, i32) {
    %c0_i32 = arith.constant 0 : i32
    %c0_i32_0 = arith.constant 0 : i32
    return %arg1, %c0_i32 : i32, i32
  }
  func.func @transform_4(%arg0: i32, %arg1: i32) -> (i32, i32) {
    %c0_i32 = arith.constant 0 : i32
    %c0_i32_0 = arith.constant 0 : i32
    return %arg1, %c0_i32 : i32, i32
  }
  func.func @transform_5(%arg0: i32, %arg1: i32) -> (i32, i32) {
    %c0_i32 = arith.constant 0 : i32
    %c0_i32_0 = arith.constant 0 : i32
    return %c0_i32, %arg0 : i32, i32
  }
}

</mosaic_0001>

<bundles_post_ra>
// kernel: tpu_custom_call.1
= control target key start
LH: loop header
LB: loop body
LE: loop exit
PB: predicated region body
PF: predicated region fallthrough
CT: control target
= control target key end

     0   :  { %s5097_s0 = inlined_call_operand.vmem [shape: f32[256,128], index: 0, kind: input, shape index: {}]   ;;  %s5098_s1 = inlined_call_operand.vmem [shape: f32[256,128], index: 1, kind: input, shape index: {}]   ;;  %s5099_s2 = inlined_call_operand.vmem [shape: s32[1,256], index: 2, kind: input, shape index: {}]   ;;  %s5100_s3 = inlined_call_operand.vmem [shape: s32[256,1], index: 3, kind: input, shape index: {}]   ;;  %s5101_s4 = inlined_call_operand.vmem [shape: s32[256,1], index: 4, kind: input, shape index: {}]   ;;  %s5102_s5 = inlined_call_operand.hbm [shape: f32[1,256], index: 5, kind: output, shape index: {}]  }
   0x1   :  { %5140 = sst [smem:[#allocation34_spill]] %s5097_s0 }
   0x2   :  { %10 = vsyncpa [#allocation7], 0 }
   0x3   :  { %12 = vsyncpa [#allocation7 + $0x1], 0  ;;  %s3491_s18 = smov 0   ;;  %s3493_s19 = smov 0  }
   0x4   :  { %s3495_s20 = smov 0   ;;  %s3497_s21 = smov 0  }
   0x5   :  { %s3499_s22 = smov 0   ;;  %s3501_s23 = smov 0  }
   0x6   :  { %s3503_s24 = smov 0   ;;  %s3505_s25 = smov 0  }
   0x7 LB: > { %5141 = sst [smem:[#allocation9_spill]] %s3446_s23  ;;  %s2390_s26 = sadd.s32 4294967295, %s3454_s25   ;;  %s3454_s25 = sphi %s3505_s25, %s18_s25   ;;  %s3450_s24 = sphi %s3503_s24, %s5395_s24   ;;  %s3446_s23 = sphi %s3501_s23, %s5394_s23   ;;  %s3442_s22 = sphi %s3499_s22, %s5399_s22   ;;  %s3438_s21 = sphi %s3497_s21, %s5392_s21   ;;  %s3434_s20 = sphi %s3495_s20, %s5398_s20   ;;  %s3430_s19 = sphi %s3493_s19, %s5397_s19   ;;  %s3426_s18 = sphi %s3491_s18, %s5396_s18  }
   0x8   : > { %5142 = sst [smem:[#allocation10_spill]] %s3450_s24  ;;  %s2391_s27 = sadd.s32 4294967294, %s3454_s25  }
   0x9   : > { %s27_s28 = sadd.s32 1, %s3446_s23  ;;  %s30_s29 = sadd.s32 1, %s3450_s24 }
   0xa   : > { %p28_p0 = scmp.ge.s32.totalorder %s27_s28, 2  ;;  %p177_p1 = scmp.ne.s32.totalorder %s3434_s20, %s3430_s19 }
   0xb   : > { %p178_p2 = scmp.eq.s32.totalorder %s2390_s26, 3  ;;  %p183_p4 = scmp.ne.s32.totalorder %s3430_s19, %s3426_s18 }
   0xc   : > { %s5401_s28 = smov (%p28_p0, %s27_s28), 0  ;;  %s5403_s29 = smov (!%p28_p0, %s30_s29), %s3450_s24 }
   0xd   : > { %5143 = sst [smem:[#allocation11_spill]] %s5401_s28  ;;  %p3540_p3 = por %p178_p2, %p177_p1 }
   0xe   : > { %p32_p5 = scmp.ge.s32.totalorder %s5403_s29, 2  ;;  %p184_p6 = scmp.eq.s32.totalorder %s2391_s27, 3 }
   0xf   : > { %p2394_p7 = scmp.ge.s32.totalorder %s3454_s25, 1  ;;  %p244_p8 = scmp.lt.s32.totalorder %s3454_s25, 5 }
  0x10   : > { %s5405_s29 = smov (%p32_p5, %s5403_s29), 0  ;;  %p3550_p9 = por %p184_p6, %p183_p4 }
  0x11   : > { %5145 = sst [smem:[#allocation12_spill]] %s5405_s29  ;;  %p245_p10 = pnand %p2394_p7, %p244_p8 }
  0x12   : > { %s164_s7 = ssub.s32 %s3450_s24, %s5405_s29  ;;  %s167_s8 = sadd.s32 1, %s3434_s20 }
  0x13   : > { %p165_p11 = scmp.eq.s32.totalorder %s164_s7, 0  ;;  %248 = sbr.rel (%p245_p10) target bundleno = 648 (0x288), region = 40 }
  0x15   : > { %s3558_s9 = scalar_select %p165_p11, %s3434_s20, %s167_s8  }
  0x17   : > { %5147 = sst [smem:[#allocation13_spill]] %s3558_s9 }
  0x1a   : > { %s3562_s11 = sshll.u32 %s3442_s22, 4  ;;  %s2397_s12 = sshll.u32 %s3438_s21, 4 }
  0x1b   : > { %p290_p12 = scmp.lt.s32.totalorder %s3562_s11, 31  ;;  %p296_p13 = scmp.lt.s32.totalorder %s2397_s12, 31 }
  0x1c   : > { %p301_p0 = scmp.lt.s32.totalorder %s3442_s22, 1  ;;  %s5148_s0 = sld [smem:[#allocation34_spill]] }
  0x1d   : > { %s291_s13 = scalar_select %p290_p12, %s3562_s11, 31 }
  0x1e   : > { %s5407_s12 = smov (!%p296_p13, %s2397_s12), 31  ;;  %p2403_p1 = scmp.ne.s32.totalorder %s3438_s21, 0 }
  0x1f   : > { %s2396_s14 = sshll.u32 %s291_s13, 3  ;;  %s2398_s27 = sshll.u32 %s5407_s12, 3  ;;  %v3456_v0 = vmov (!%p2403_p1), -inf   ;;  %v3457_v1 = vmov (!%p2403_p1), 0.0  }
  0x20   : > { %s3574_s26 = scalar_select %p301_p0, %s3442_s22, 1 }
  0x21   : > { %s3579_s10 = scalar_lea.vmem %s5098_s1, %s2398_s27  ;;  %s3588_s15 = scalar_lea.vmem %s5100_s3, %s2398_s27  ;;  %320 = vst [vmem:[#allocation2] sm:$0x1] (!%p2403_p1), %v3456_v0  ;;  %322 = vst [vmem:[#allocation4] sm:$0x1] (!%p2403_p1), %v3456_v0 }
  0x22   : > { %s3571_s17 = scalar_lea.vmem %s5148_s0, %s2396_s14  ;;  %s303_s24 = scalar_lea.vmem %s5099_s2, %s3574_s26  ;;  %321 = vst [vmem:[#allocation3] sm:$0x1] (!%p2403_p1), %v3457_v1  ;;  %323 = vst [vmem:[#allocation5] sm:$0x1] (!%p2403_p1), %v3457_v1 }
  0x23   : > { %s3593_s0 = scalar_lea.vmem %s5101_s4, %s2398_s27  ;;  %s5149_s12 = sand.u32 1, %s3430_s19  }
  0x24   : > { %s3597_s9 = scalar_lea.vmem [#allocation6], %s5149_s12  ;;  %319 = sbr.rel (%p2403_p1) target bundleno = 43 (0x2b), region = 44 }
  0x2b PF: > { %v3601_v2 = vld [vmem:[%s3571_s17] sm:$0xff]  ;;  %v3604_v3 = vld [vmem:[%s3571_s17 + $0x8] sm:$0xff]  ;;  %v3607_v4 = vld [vmem:[%s3571_s17 + $0x10] sm:$0xff]  ;;  %s2406_s23 = sshll.u32 %s3442_s22, 7  ;;  %p2407_p2 = scmp.ne.s32.totalorder %s3438_s21, 1 }
  0x2c   : > { %v357_v5 = vand.u32 4294901760, %v3601_v2  ;;  %v360_v6 = vand.u32 4294901760, %v3604_v3  ;;  %v3612_v7 = vld [vmem:[%s3571_s17 + $0x18] sm:$0xff]  ;;  %v363_v8 = vand.u32 4294901760, %v3607_v4  ;;  %v344_v12 = vld [vmem:[%s3571_s17 + $0x20] sm:$0xff]  ;;  %v345_v13 = vld [vmem:[%s3571_s17 + $0x28] sm:$0xff] }
  0x2d   : > { %v366_v9 = vand.u32 4294901760, %v3612_v7  ;;  %v324_v14 = vld [vmem:[%s3579_s10] sm:$0xff]  ;;  %v369_v16 = vand.u32 4294901760, %v344_v12  ;;  %v372_v17 = vand.u32 4294901760, %v345_v13  ;;  %v346_v21 = vld [vmem:[%s3571_s17 + $0x30] sm:$0xff]  ;;  %v347_v22 = vld [vmem:[%s3571_s17 + $0x38] sm:$0xff] }
  0x2e   : > { %v3620_v10 = vpack.c.bf16 %v360_v6, %v357_v5  ;;  %v3635_v15 = vand.u32 4294901760, %v324_v14  ;;  %v375_v25 = vand.u32 4294901760, %v346_v21  ;;  %v378_v26 = vand.u32 4294901760, %v347_v22  ;;  %v348_v28 = vld [vmem:[%s3571_s17 + $0x40] sm:$0xff]  ;;  %v349_v29 = vld [vmem:[%s3571_s17 + $0x48] sm:$0xff]  ;;  %v350_v33 = vld [vmem:[%s3571_s17 + $0x50] sm:$0xff] }
  0x2f   : > { %v3626_v11 = vpack.c.bf16 %v366_v9, %v363_v8  ;;  %v3643_v20 = vpack.c.bf16 %v372_v17, %v369_v16  ;;  %v381_v30 = vand.u32 4294901760, %v348_v28  ;;  %v384_v31 = vand.u32 4294901760, %v349_v29  ;;  %v351_v34 = vld [vmem:[%s3571_s17 + $0x58] sm:$0xff]  ;;  %v352_v38 = vld [vmem:[%s3571_s17 + $0x60] sm:$0xff]  ;;  %v353_v39 = vld [vmem:[%s3571_s17 + $0x68] sm:$0xff] }
  0x30   : > { %2940 = vmatprep.subr.bf16.mxu1 %v3620_v10  ;;  %3036 = vmatprep.subr.bf16.mxu0 %v3620_v10  ;;  %v3640_v18 = vsub.f32 %v324_v14, %v3635_v15  ;;  %v3652_v27 = vpack.c.bf16 %v378_v26, %v375_v25  ;;  %v387_v35 = vand.u32 4294901760, %v350_v33  ;;  %v390_v36 = vand.u32 4294901760, %v351_v34  ;;  %v354_v42 = vld [vmem:[%s3571_s17 + $0x70] sm:$0xff]  ;;  %v355_v48 = vld [vmem:[%s3571_s17 + $0x78] sm:$0xff]  ;;  %v325_v62 = vld [vmem:[%s3579_s10 + $0x8] sm:$0xff] }
  0x31   : > { %2942 = vmatpush3.bf16.xpose.msra.mxu1 %v3620_v10  ;;  %3038 = vmatpush3.bf16.xpose.msra.mxu0 %v3620_v10  ;;  %v3660_v32 = vpack.c.bf16 %v384_v31, %v381_v30  ;;  %v393_v40 = vand.u32 4294901760, %v352_v38  ;;  %v396_v41 = vand.u32 4294901760, %v353_v39  ;;  %v399_v43 = vand.u32 4294901760, %v354_v42 }
  0x32   : > { %2944 = vmatprep.subr.bf16.mxu1 %v3626_v11  ;;  %3040 = vmatprep.subr.bf16.mxu0 %v3626_v11  ;;  %5150 = vst [vmem:[#allocation14_spill] sm:$0xff] %v3640_v18  ;;  %v439_v19 = vand.u32 4294901760, %v3640_v18  ;;  %5151 = vst [vmem:[#allocation15_spill] sm:$0xff] %v3652_v27  ;;  %v3668_v37 = vpack.c.bf16 %v390_v36, %v387_v35  ;;  %v599_v45 = vsub.f32 %v3601_v2, %v357_v5 }
  0x33   : > { %5152 = vst [vmem:[#allocation16_spill] sm:$0xff] %v3660_v32  ;;  %v3677_v44 = vpack.c.bf16 %v396_v41, %v393_v40  ;;  %v606_v46 = vsub.f32 %v3604_v3, %v360_v6  ;;  %v3688_v47 = vsub.f32 %v3607_v4, %v363_v8  ;;  %v3694_v49 = vsub.f32 %v3612_v7, %v366_v9  ;;  %v326_v8 = vld [vmem:[%s3579_s10 + $0x10] sm:$0xff]  ;;  %v327_v9 = vld [vmem:[%s3579_s10 + $0x18] sm:$0xff] }
  0x34   : > { %v440_v23 = vsub.f32 %v3640_v18, %v439_v19  ;;  %2803 = vmatprep.mubr.f32.mxu0 %v439_v19  ;;  %5153 = vst [vmem:[#allocation17_spill] sm:$0xff] %v3668_v37  ;;  %v3696_v50 = vsub.f32 %v344_v12, %v369_v16  ;;  %v3698_v51 = vsub.f32 %v345_v13, %v372_v17  ;;  %v402_v61 = vand.u32 4294901760, %v355_v48  ;;  %v328_v16 = vld [vmem:[%s3579_s10 + $0x20] sm:$0xff] }
  0x35   : > { %5154 = vst [vmem:[#allocation18_spill] sm:$0xff] %v3677_v44  ;;  %v3700_v52 = vsub.f32 %v346_v21, %v375_v25  ;;  %v3702_v53 = vsub.f32 %v347_v22, %v378_v26  ;;  %v3704_v54 = vsub.f32 %v348_v28, %v381_v30  ;;  %v3706_v55 = vsub.f32 %v349_v29, %v384_v31  ;;  %v329_v25 = vld [vmem:[%s3579_s10 + $0x28] sm:$0xff] }
  0x36   : > { %v441_v24 = vand.u32 4294901760, %v440_v23  ;;  %v3708_v56 = vpack.c.bf16 %v606_v46, %v599_v45  ;;  %v3710_v57 = vsub.f32 %v350_v33, %v387_v35  ;;  %v3712_v58 = vsub.f32 %v351_v34, %v390_v36 }
  0x37   : > { %v3714_v59 = vsub.f32 %v352_v38, %v393_v40  ;;  %v3718_v60 = vpack.c.bf16 %v3694_v49, %v3688_v47  ;;  %v3723_v63 = vsub.f32 %v353_v39, %v396_v41  ;;  %v3727_v0 = vpack.c.bf16 %v3698_v51, %v3696_v50  ;;  %v330_v38 = vld [vmem:[%s3579_s10 + $0x30] sm:$0xff]  ;;  %v331_v39 = vld [vmem:[%s3579_s10 + $0x38] sm:$0xff] }
  0x38   : > { %2635 = vmatprep.mubr.f32.mxu1 %v441_v24  ;;  %v3731_v1 = vpack.c.bf16 %v3702_v53, %v3700_v52  ;;  %v600_v2 = vand.u32 4294901760, %v599_v45  ;;  %v607_v3 = vand.u32 4294901760, %v606_v46  ;;  %v3737_v4 = vpack.c.bf16 %v3706_v55, %v3704_v54 }
  0x39   : > { %2946 = vmatpush3.bf16.xpose.msra.mxu1 %v3626_v11  ;;  %3042 = vmatpush3.bf16.xpose.msra.mxu0 %v3626_v11  ;;  %v3741_v5 = vpack.c.bf16 %v3712_v58, %v3710_v57  ;;  %v3745_v6 = vpack.c.bf16 %v3723_v63, %v3714_v59  ;;  %v3747_v7 = vand.u32 4294901760, %v325_v62  ;;  %v3751_v12 = vpack.c.bf16 %v402_v61, %v399_v43 }
  0x3a   : > { %2948 = vmatprep.subr.bf16.mxu1 %v3643_v20  ;;  %3044 = vmatprep.subr.bf16.mxu0 %v3643_v20  ;;  %5155 = vst [vmem:[#allocation19_spill] sm:$0xff] %v3737_v4  ;;  %v601_v13 = vsub.f32 %v599_v45, %v600_v2  ;;  %v608_v14 = vsub.f32 %v606_v46, %v607_v3  ;;  %v3754_v17 = vand.u32 4294901760, %v326_v8  ;;  %v3763_v23 = vand.u32 4294901760, %v327_v9  ;;  %v332_v46 = vld [vmem:[%s3579_s10 + $0x40] sm:$0xff] }
  0x3b   : > { %5156 = vst [vmem:[#allocation20_spill] sm:$0xff] %v3741_v5  ;;  %5157 = vst [vmem:[#allocation21_spill] sm:$0xff] %v3745_v6  ;;  %v3756_v19 = vsub.f32 %v354_v42, %v399_v43  ;;  %v3758_v21 = vsub.f32 %v355_v48, %v402_v61  ;;  %v3761_v22 = vsub.f32 %v325_v62, %v3747_v7  ;;  %v3767_v24 = vand.u32 4294901760, %v328_v16 }
  0x3c   : > { %5158 = vst [vmem:[#allocation22_spill] sm:$0xff] %v3751_v12  ;;  %v602_v28 = vand.u32 4294901760, %v601_v13  ;;  %v609_v29 = vand.u32 4294901760, %v608_v14  ;;  %v614_v30 = vand.u32 4294901760, %v3688_v47  ;;  %v621_v31 = vand.u32 4294901760, %v3694_v49  ;;  %v1642_v14 = vld [vmem:[%s3588_s15] sm:$0xff] }
  0x3d   : > { %5159 = vst [vmem:[#allocation23_spill] sm:$0xff] %v3761_v22  ;;  %v3772_v26 = vpack.c.bf16 %v3758_v21, %v3756_v19  ;;  %v3779_v33 = vsub.f32 %v326_v8, %v3754_v17  ;;  %v449_v34 = vand.u32 4294901760, %v3761_v22  ;;  %v3783_v35 = vsub.f32 %v327_v9, %v3763_v23 }
  0x3e   : > { %v3785_v36 = vand.u32 4294901760, %v329_v25  ;;  %v3790_v40 = vsub.f32 %v328_v16, %v3767_v24  ;;  %v2971_v41 = vpack.c.bf16 %v609_v29, %v602_v28  ;;  %v3067_v42 = vpack.c.bf16 %v607_v3, %v600_v2  ;;  %v333_v2 = vld [vmem:[%s3579_s10 + $0x48] sm:$0xff]  ;;  %v1644_v3 = vld [vmem:[%s3588_s15 + $0x10] sm:$0xff] }
  0x3f   : > { %5160 = vst [vmem:[#allocation24_spill] sm:$0xff] %v3772_v26  ;;  %5161 = vst [vmem:[#allocation25_spill] sm:$0xff] %v3779_v33  ;;  %v615_v43 = vsub.f32 %v3688_v47, %v614_v30  ;;  %v622_v45 = vsub.f32 %v3694_v49, %v621_v31  ;;  %v459_v48 = vand.u32 4294901760, %v3779_v33  ;;  %v3796_v61 = vand.u32 4294901760, %v330_v38 }
  0x40   : > { %5162 = vst [vmem:[#allocation26_spill] sm:$0xff] %v3783_v35  ;;  %v3798_v62 = vand.u32 4294901760, %v331_v39  ;;  %v450_v8 = vsub.f32 %v3761_v22, %v449_v34  ;;  %v3803_v13 = vsub.f32 %v329_v25, %v3785_v36  ;;  %v3808_v49 = vand.u32 4294901760, %v332_v46 }
  0x41   : > { %2950 = vmatpush3.bf16.xpose.msra.mxu1 %v3643_v20  ;;  %3046 = vmatpush3.bf16.xpose.msra.mxu0 %v3643_v20  ;;  %v616_v16 = vand.u32 4294901760, %v615_v43  ;;  %v623_v28 = vand.u32 4294901760, %v622_v45  ;;  %v628_v29 = vand.u32 4294901760, %v3696_v50  ;;  %v635_v25 = vand.u32 4294901760, %v3698_v51 }
  0x42   : > { %2952 = vmatprep.subr.bf16.mxu1 %v3652_v27  ;;  %3048 = vmatprep.subr.bf16.mxu0 %v3652_v27  ;;  %5163 = vst [vmem:[#allocation27_spill] sm:$0xff] %v3803_v13  ;;  %v460_v9 = vsub.f32 %v3779_v33, %v459_v48  ;;  %v3817_v22 = vsub.f32 %v330_v38, %v3796_v61  ;;  %v451_v43 = vand.u32 4294901760, %v450_v8  ;;  %v5165_v45 = vand.u32 4294901760, %v3783_v35  ;;  %v334_v38 = vld [vmem:[%s3579_s10 + $0x50] sm:$0xff] }
  0x43   : > { %v3820_v47 = vsub.f32 %v331_v39, %v3798_v62  ;;  %v3828_v33 = vand.u32 4294901760, %v333_v2  ;;  %v5166_v39 = vand.u32 4294901760, %v3790_v40  ;;  %v2975_v8 = vpack.c.bf16 %v623_v28, %v616_v16 }
  0x44   : > { %5164 = vst [vmem:[#allocation28_spill] sm:$0xff] %v3817_v22  ;;  %v470_v26 = vsub.f32 %v3783_v35, %v5165_v45  ;;  %v3071_v5 = vpack.c.bf16 %v621_v31, %v614_v30  ;;  %v629_v18 = vsub.f32 %v3696_v50, %v628_v29  ;;  %v636_v45 = vsub.f32 %v3698_v51, %v635_v25 }
  0x45   : > { %v480_v6 = vsub.f32 %v3790_v40, %v5166_v39  ;;  %v3843_v4 = vand.u32 4294901760, %v334_v38  ;;  %v5168_v39 = vand.u32 4294901760, %v3803_v13  ;;  %v3849_v50 = vsub.f32 %v333_v2, %v3828_v33 }
  0x46   : > { %v637_v28 = vand.u32 4294901760, %v636_v45  ;;  %v642_v2 = vand.u32 4294901760, %v3700_v52  ;;  %v1643_v45 = vld [vmem:[%s3588_s15 + $0x8] sm:$0xff] }
  0x47   : > { %5167 = vst [vmem:[#allocation29_spill] sm:$0xff] %v3843_v4  ;;  %v490_v30 = vsub.f32 %v3803_v13, %v5168_v39  ;;  %5169 = vst [vmem:[#allocation30_spill] sm:$0xff] %v3849_v50  ;;  %v481_v31 = vand.u32 4294901760, %v480_v6  ;;  %v5172_v39 = vand.u32 4294901760, %v3783_v35 }
  0x49   : > { %2954 = vmatpush3.bf16.xpose.msra.mxu1 %v3652_v27  ;;  %3050 = vmatpush3.bf16.xpose.msra.mxu0 %v3652_v27  ;;  %v338_v27 = vld [vmem:[%s3579_s10 + $0x70] sm:$0xff] }
  0x4a   : > { %2956 = vmatprep.subr.bf16.mxu1 %v3660_v32  ;;  %3052 = vmatprep.subr.bf16.mxu0 %v3660_v32 }
  0x51   : > { %2958 = vmatpush3.bf16.xpose.msra.mxu1 %v3660_v32  ;;  %3054 = vmatpush3.bf16.xpose.msra.mxu0 %v3660_v32  ;;  %v461_v32 = vand.u32 4294901760, %v460_v9 }
  0x52   : > { %2960 = vmatprep.subr.bf16.mxu1 %v3668_v37  ;;  %3056 = vmatprep.subr.bf16.mxu0 %v3668_v37 }
  0x59   : > { %2962 = vmatpush3.bf16.xpose.msra.mxu1 %v3668_v37  ;;  %3058 = vmatpush3.bf16.xpose.msra.mxu0 %v3668_v37  ;;  %v3835_v37 = vsub.f32 %v332_v46, %v3808_v49  ;;  %v471_v46 = vand.u32 4294901760, %v470_v26  ;;  %v630_v26 = vand.u32 4294901760, %v629_v18  ;;  %v1645_v18 = vld [vmem:[%s3588_s15 + $0x18] sm:$0xff] }
  0x5a   : > { %2964 = vmatprep.subr.bf16.mxu1 %v3677_v44  ;;  %3060 = vmatprep.subr.bf16.mxu0 %v3677_v44 }
  0x5b   : > { %v2979_v35 = vpack.c.bf16 %v637_v28, %v630_v26 }
  0x61   : > { %2966 = vmatpush3.bf16.xpose.msra.mxu1 %v3677_v44  ;;  %3062 = vmatpush3.bf16.xpose.msra.mxu0 %v3677_v44  ;;  %v336_v44 = vld [vmem:[%s3579_s10 + $0x60] sm:$0xff] }
  0x62   : > { %2968 = vmatprep.subr.bf16.mxu1 %v3751_v12  ;;  %3064 = vmatprep.subr.bf16.mxu0 %v3751_v12  ;;  %v3854_v16 = vand.u32 4294901760, %v336_v44 }
  0x69   : > { %2970 = vmatpush3.bf16.xpose.msra.mxu1 %v3751_v12  ;;  %3066 = vmatpush3.bf16.xpose.msra.mxu0 %v3751_v12  ;;  %v5116_v12 = vmov 0  }
  0x6a   : > { %2972 = vmatprep.subr.bf16.mxu1 %v2971_v41  ;;  %3068 = vmatprep.subr.bf16.mxu0 %v3067_v42 }
  0x6b   : > { %3287 = vset.pattern.permute.xlu1 %v5116_v12  ;;  %3286 = vset.pattern.permute.xlu0 %v5116_v12  ;;  %v335_v12 = vld [vmem:[%s3579_s10 + $0x58] sm:$0xff] }
  0x6c   : > { %1666 = vperm.xlu1 %3287, %v1644_v3   ;;  %1660 = vperm.xlu0 %3286, %v1642_v14   ;;  %v5123_v3 = vand.u32 4294901760, %v3817_v22  ;;  %v5126_v14 = vand.u32 4294901760, %v3820_v47  ;;  %v3851_v51 = vand.u32 4294901760, %v335_v12 }
  0x6e   : > { %5170 = vst [vmem:[#allocation31_spill] sm:$0xff] %v3851_v51  ;;  %v500_v6 = vsub.f32 %v3817_v22, %v5123_v3  ;;  %v3874_v9 = vsub.f32 %v335_v12, %v3851_v51  ;;  %v643_v12 = vsub.f32 %v3700_v52, %v642_v2 }
  0x70   : > { %2636 = vmatmul.mubr.f32.vlgmr.msra.gmra.mrb[0].mxu1 %v451_v43  ;;  %2804 = vmatmul.mubr.f32.vlgmr.msra.gmra.mrb[0].mxu0 %v449_v34  ;;  %v337_v34 = vld [vmem:[%s3579_s10 + $0x68] sm:$0xff]  ;;  %v649_v43 = vand.u32 4294901760, %v3702_v53  ;;  %5173 = vst [vmem:[#allocation33_spill] sm:$0xff] %v3874_v9  ;;  %v549_v26 = vand.u32 4294901760, %v3874_v9 }
  0x71   : > { %2974 = vmatpush3.bf16.xpose.msra.mxu1 %v2971_v41  ;;  %3070 = vmatpush3.bf16.xpose.msra.mxu0 %v3067_v42  ;;  %v510_v41 = vsub.f32 %v3820_v47, %v5126_v14  ;;  %v3866_v42 = vsub.f32 %v334_v38, %v3843_v4  ;;  %v3876_v3 = vand.u32 4294901760, %v337_v34  ;;  %v3075_v14 = vpack.c.bf16 %v635_v25, %v628_v29 }
  0x72   : > { %2976 = vmatprep.subr.bf16.mxu1 %v2975_v8  ;;  %3072 = vmatprep.subr.bf16.mxu0 %v3071_v5  ;;  %v5174_v38 = vand.u32 4294901760, %v3790_v40  ;;  %v5175_v4 = vand.u32 4294901760, %v3835_v37  ;;  %v650_v51 = vsub.f32 %v3702_v53, %v649_v43  ;;  %v501_v29 = vand.u32 4294901760, %v500_v6 }
  0x73   : > { %2638 = vmatprep.mubr.f32.mxu1 %v461_v32  ;;  %2806 = vmatprep.mubr.f32.mxu0 %v459_v48  ;;  %5171 = vst [vmem:[#allocation32_spill] sm:$0xff] %v3866_v42  ;;  %v491_v32 = vand.u32 4294901760, %v490_v30  ;;  %v529_v48 = vand.u32 4294901760, %v3849_v50  ;;  %v339_v30 = vld [vmem:[%s3579_s10 + $0x78] sm:$0xff]  ;;  %v511_v25 = vand.u32 4294901760, %v510_v41  ;;  %v3898_v52 = vsub.f32 %v337_v34, %v3876_v3 }
  0x74   : > { %2639 = vmatmul.mubr.f32.gmra.mrb[2].mxu1 %v471_v46  ;;  %2807 = vmatmul.mubr.f32.gmra.mrb[2].mxu0 %v5172_v39  ;;  %v520_v46 = vsub.f32 %v3835_v37, %v5175_v4  ;;  %v3885_v39 = vsub.f32 %v336_v44, %v3854_v16  ;;  %v5176_v4 = vand.u32 4294901760, %v3803_v13  ;;  %v3900_v53 = vand.u32 4294901760, %v339_v30 }
  0x75   : > { %2641 = vmatprep.mubr.f32.mxu1 %v481_v31  ;;  %2809 = vmatprep.mubr.f32.mxu0 %v5174_v38  ;;  %v539_v31 = vand.u32 4294901760, %v3866_v42  ;;  %v3891_v38 = vand.u32 4294901760, %v338_v27  ;;  %v530_v44 = vsub.f32 %v3849_v50, %v529_v48  ;;  %v644_v41 = vand.u32 4294901760, %v643_v12 }
  0x76   : > { %1669 = vperm.xlu1 %3287, %v1645_v18   ;;  %1663 = vperm.xlu0 %3286, %v1643_v45   ;;  %v521_v28 = vand.u32 4294901760, %v520_v46  ;;  %v559_v6 = vand.u32 4294901760, %v3885_v39  ;;  %v651_v18 = vand.u32 4294901760, %v650_v51  ;;  %v656_v45 = vand.u32 4294901760, %v3704_v54  ;;  %v1646_v46 = vld [vmem:[%s3588_s15 + $0x20] sm:$0xff] }
  0x77   : > { %v5177_v34 = vand.u32 4294901760, %v3817_v22  ;;  %v5178_v50 = vand.u32 4294901760, %v3820_v47  ;;  %v531_v51 = vand.u32 4294901760, %v530_v44  ;;  %v550_v12 = vsub.f32 %v3874_v9, %v549_v26 }
  0x78   : > { %2642 = vmatmul.mubr.f32.gmra.mrb[4].mxu1 %v491_v32  ;;  %2810 = vmatmul.mubr.f32.gmra.mrb[4].mxu0 %v5176_v4  ;;  %v663_v32 = vand.u32 4294901760, %v3706_v55  ;;  %v540_v4 = vsub.f32 %v3866_v42, %v539_v31  ;;  %v569_v13 = vand.u32 4294901760, %v3898_v52  ;;  %v5179_v42 = vand.u32 4294901760, %v3835_v37 }
  0x79   : > { %2978 = vmatpush3.bf16.xpose.msra.mxu1 %v2975_v8  ;;  %3074 = vmatpush3.bf16.xpose.msra.mxu0 %v3071_v5  ;;  %v3909_v8 = vsub.f32 %v338_v27, %v3891_v38  ;;  %v1647_v5 = vld [vmem:[%s3588_s15 + $0x28] sm:$0xff]  ;;  %v560_v27 = vsub.f32 %v3885_v39, %v559_v6  ;;  %v2983_v22 = vpack.c.bf16 %v651_v18, %v644_v41  ;;  %v1649_v18 = vld [vmem:[%s3588_s15 + $0x38] sm:$0xff] }
  0x7a   : > { %2980 = vmatprep.subr.bf16.mxu1 %v2979_v35  ;;  %3076 = vmatprep.subr.bf16.mxu0 %v3075_v14  ;;  %v541_v44 = vand.u32 4294901760, %v540_v4  ;;  %v1648_v4 = vld [vmem:[%s3588_s15 + $0x30] sm:$0xff] }
  0x7b   : > { %2644 = vmatprep.mubr.f32.mxu1 %v501_v29  ;;  %2812 = vmatprep.mubr.f32.mxu0 %v5177_v34  ;;  %v3918_v29 = vsub.f32 %v339_v30, %v3900_v53  ;;  %v3079_v34 = vpack.c.bf16 %v649_v43, %v642_v2  ;;  %v579_v9 = vand.u32 4294901760, %v3909_v8  ;;  %v551_v2 = vand.u32 4294901760, %v550_v12 }
  0x7c   : > { %2645 = vmatmul.mubr.f32.gmra.mrb[6].mxu1 %v511_v25  ;;  %2813 = vmatmul.mubr.f32.gmra.mrb[6].mxu0 %v5178_v50  ;;  %v657_v25 = vsub.f32 %v3704_v54, %v656_v45  ;;  %v664_v50 = vsub.f32 %v3706_v55, %v663_v32  ;;  %v570_v43 = vsub.f32 %v3898_v52, %v569_v13  ;;  %v561_v30 = vand.u32 4294901760, %v560_v27 }
  0x7d   : > { %2647 = vmatprep.mubr.f32.mxu1 %v521_v28  ;;  %2815 = vmatprep.mubr.f32.mxu0 %v5179_v42  ;;  %v589_v42 = vand.u32 4294901760, %v3918_v29  ;;  %v670_v28 = vand.u32 4294901760, %v3710_v57  ;;  %v580_v41 = vsub.f32 %v3909_v8, %v579_v9 }
  0x7e   : > { %1675 = vperm.xlu1 %3287, %v1647_v5   ;;  %1672 = vperm.xlu0 %3286, %v1646_v46   ;;  %v658_v54 = vand.u32 4294901760, %v657_v25  ;;  %v665_v55 = vand.u32 4294901760, %v664_v50  ;;  %v3083_v5 = vpack.c.bf16 %v663_v32, %v656_v45  ;;  %v1728_v46 = vld [vmem:[%s3593_s0 + $0x8] sm:$0xff]  ;;  %v1730_v32 = vld [vmem:[%s3593_s0 + $0x18] sm:$0xff]  ;;  %v1729_v50 = vld [vmem:[%s3593_s0 + $0x10] sm:$0xff] }
  0x7f   : > { %v671_v27 = vsub.f32 %v3710_v57, %v670_v28  ;;  %vm1744_vm0 = vcmp.ne.s32.totalorder %v1728_v46, 0  ;;  %v684_v57 = vand.u32 4294901760, %v3714_v59  ;;  %vm1746_vm2 = vcmp.ne.s32.totalorder %v1730_v32, 0  ;;  %v1652_v32 = vld [vmem:[%s3588_s15 + $0x50] sm:$0xff] }
  0x80   : > { %2648 = vmatmul.mubr.f32.gmra.mrb[8].mxu1 %v531_v51  ;;  %2816 = vmatmul.mubr.f32.gmra.mrb[8].mxu0 %v529_v48  ;;  %v677_v48 = vand.u32 4294901760, %v3712_v58  ;;  %v1727_v51 = vld [vmem:[%s3593_s0] sm:$0xff]  ;;  %v2987_v12 = vpack.c.bf16 %v665_v55, %v658_v54  ;;  %vm1745_vm3 = vcmp.ne.s32.totalorder %v1729_v50, 0  ;;  %v1738_v50 = vld [vmem:[%s3593_s0 + $0x58] sm:$0xff] }
  0x81   : > { %2982 = vmatpush3.bf16.xpose.msra.mxu1 %v2979_v35  ;;  %3078 = vmatpush3.bf16.xpose.msra.mxu0 %v3075_v14  ;;  %v571_v35 = vand.u32 4294901760, %v570_v43  ;;  %v590_v14 = vsub.f32 %v3918_v29, %v589_v42  ;;  %vm1743_vm1 = vcmp.ne.s32.totalorder %v1727_v51, 0  ;;  %v685_v43 = vsub.f32 %v3714_v59, %v684_v57  ;;  %v1731_v54 = vld [vmem:[%s3593_s0 + $0x20] sm:$0xff] }
  0x82   : > { %2984 = vmatprep.subr.bf16.mxu1 %v2983_v22  ;;  %3080 = vmatprep.subr.bf16.mxu0 %v3079_v34  ;;  %v678_v25 = vsub.f32 %v3712_v58, %v677_v48  ;;  %v691_v58 = vand.u32 4294901760, %v3723_v63  ;;  %vm1747_vm5 = vcmp.ne.s32.totalorder %v1731_v54, 0  ;;  %vm1754_vm10 = vcmp.ne.s32.totalorder %v1738_v50, 0  ;;  %v1657_v54 = vld [vmem:[%s3588_s15 + $0x78] sm:$0xff] }
  0x83   : > { %2650 = vmatprep.mubr.f32.mxu1 %v541_v44  ;;  %2818 = vmatprep.mubr.f32.mxu0 %v539_v31  ;;  %v581_v31 = vand.u32 4294901760, %v580_v41  ;;  %v5180_v44 = vmov 0   ;;  %v1734_v41 = vld [vmem:[%s3593_s0 + $0x38] sm:$0xff] }
  0x84   : > { %2651 = vmatmul.mubr.f32.gmra.mrb[10].mxu1 %v551_v2  ;;  %2819 = vmatmul.mubr.f32.gmra.mrb[10].mxu0 %v549_v26  ;;  %v591_v26 = vand.u32 4294901760, %v590_v14  ;;  %v679_v45 = vand.u32 4294901760, %v678_v25  ;;  %v1830_v2 = vsel %vm1743_vm1, 1, %v5180_v44  ;;  %v1832_v55 = vsel %vm1745_vm3, 1, %v5180_v44 }
  0x85   : > { %2653 = vmatprep.mubr.f32.mxu1 %v561_v30  ;;  %2821 = vmatprep.mubr.f32.mxu0 %v559_v6  ;;  %v672_v6 = vand.u32 4294901760, %v671_v27  ;;  %v692_v30 = vsub.f32 %v3723_v63, %v691_v58  ;;  %v698_v63 = vand.u32 4294901760, %v3756_v19  ;;  %vm1750_vm6 = vcmp.ne.s32.totalorder %v1734_v41, 0 }
  0x86   : > { %1681 = vperm.xlu1 %3287, %v1649_v18   ;;  %1678 = vperm.xlu0 %3286, %v1648_v4   ;;  %v1733_v18 = vld [vmem:[%s3593_s0 + $0x30] sm:$0xff] }
  0x87   : > { %v693_v59 = vand.u32 4294901760, %v692_v30  ;;  %vm1749_vm7 = vcmp.ne.s32.totalorder %v1733_v18, 0  ;;  %v699_v46 = vsub.f32 %v3756_v19, %v698_v63  ;;  %v1651_v19 = vld [vmem:[%s3588_s15 + $0x48] sm:$0xff] }
  0x88   : > { %2654 = vmatmul.mubr.f32.gmra.mrb[12].mxu1 %v571_v35  ;;  %2822 = vmatmul.mubr.f32.gmra.mrb[12].mxu0 %v569_v13  ;;  %v1831_v13 = vsel %vm1744_vm0, 1, %v5180_v44  ;;  %v1834_v35 = vsel %vm1747_vm5, 1, %v5180_v44  ;;  %v1836_v27 = vsel %vm1749_vm7, 1, %v5180_v44  ;;  %v1655_v30 = vld [vmem:[%s3588_s15 + $0x68] sm:$0xff]  ;;  %vm5137_vm7 = vmmov 1  }
  0x89   : > { %2986 = vmatpush3.bf16.xpose.msra.mxu1 %v2983_v22  ;;  %3082 = vmatpush3.bf16.xpose.msra.mxu0 %v3079_v34  ;;  %v3087_v22 = vpack.c.bf16 %v677_v48, %v670_v28  ;;  %v2991_v34 = vpack.c.bf16 %v679_v45, %v672_v6  ;;  %v686_v28 = vand.u32 4294901760, %v685_v43  ;;  %v705_v48 = vand.u32 4294901760, %v3758_v21  ;;  %v1736_v45 = vld [vmem:[%s3593_s0 + $0x48] sm:$0xff] }
  0x8a   : > { %2988 = vmatprep.subr.bf16.mxu1 %v2987_v12  ;;  %3084 = vmatprep.subr.bf16.mxu0 %v3083_v5  ;;  %v700_v25 = vand.u32 4294901760, %v699_v46  ;;  %vm1752_vm8 = vcmp.ne.s32.totalorder %v1736_v45, 0  ;;  %v5183_v18 = vld [vmem:[#allocation31_spill] sm:$0xff] }
  0x8b   : > { %2656 = vmatprep.mubr.f32.mxu1 %v581_v31  ;;  %2824 = vmatprep.mubr.f32.mxu0 %v579_v9  ;;  %v1732_v9 = vld [vmem:[%s3593_s0 + $0x28] sm:$0xff]  ;;  %v2995_v14 = vpack.c.bf16 %v693_v59, %v686_v28  ;;  %v706_v51 = vsub.f32 %v3758_v21, %v705_v48  ;;  %v1650_v21 = vld [vmem:[%s3588_s15 + $0x40] sm:$0xff]  ;;  %v3095_v6 = vpack.c.bf16 %v705_v48, %v698_v63 }
  0x8c   : > { %2657 = vmatmul.mubr.f32.gmra.mrb[14].mxu1 %v591_v26  ;;  %2825 = vmatmul.mubr.f32.gmra.mrb[14].mxu0 %v589_v42  ;;  %v1833_v42 = vsel %vm1746_vm2, 1, %v5180_v44  ;;  %vm1748_vm4 = vcmp.ne.s32.totalorder %v1732_v9, 0  ;;  %v1654_v9 = vld [vmem:[%s3588_s15 + $0x60] sm:$0xff]  ;;  %v5181_v59 = vld [vmem:[#allocation15_spill] sm:$0xff] }
  0x8d   : > { %2691 = vmatprep.mubr.f32.mxu1 %v3635_v15  ;;  %2859 = vmatprep.mubr.f32.mxu0 %v3635_v15  ;;  %v1835_v4 = vsel %vm1748_vm4, 1, %v5180_v44  ;;  %v707_v31 = vand.u32 4294901760, %v706_v51  ;;  %v5182_v63 = vld [vmem:[#allocation29_spill] sm:$0xff]  ;;  %v5193_v46 = vld [vmem:[#allocation23_spill] sm:$0xff] }
  0x8e   : > { %1850 = vperm.xlu1 %3287, %v1831_v13   ;;  %1847 = vperm.xlu0 %3286, %v1830_v2   ;;  %v1737_v13 = vld [vmem:[%s3593_s0 + $0x50] sm:$0xff]  ;;  %v1839_v2 = vsel %vm1752_vm8, 1, %v5180_v44  ;;  %v5194_v51 = vld [vmem:[#allocation25_spill] sm:$0xff] }
  0x8f   : > { %v2999_v26 = vpack.c.bf16 %v707_v31, %v700_v25  ;;  %vm1753_vm11 = vcmp.ne.s32.totalorder %v1737_v13, 0  ;;  %v5197_v25 = vld [vmem:[#allocation28_spill] sm:$0xff] }
  0x90   : > { %v1840_v43 = vsel %vm1753_vm11, 1, %v5180_v44 }
  0x91   : > { %2990 = vmatpush3.bf16.xpose.msra.mxu1 %v2987_v12  ;;  %3086 = vmatpush3.bf16.xpose.msra.mxu0 %v3083_v5  ;;  %v3091_v5 = vpack.c.bf16 %v691_v58, %v684_v57  ;;  %v1837_v12 = vsel %vm1750_vm6, 1, %v5180_v44  ;;  %v1735_v57 = vld [vmem:[%s3593_s0 + $0x40] sm:$0xff]  ;;  %v1653_v58 = vld [vmem:[%s3588_s15 + $0x58] sm:$0xff] }
  0x92   : > { %2992 = vmatprep.subr.bf16.mxu1 %v2991_v34  ;;  %3088 = vmatprep.subr.bf16.mxu0 %v3087_v22  ;;  %vm1751_vm9 = vcmp.ne.s32.totalorder %v1735_v57, 0 }
  0x93   : > { %1856 = vperm.xlu1 %3287, %v1833_v42   ;;  %1853 = vperm.xlu0 %3286, %v1832_v55   ;;  %v1656_v42 = vld [vmem:[%s3588_s15 + $0x70] sm:$0xff] }
  0x97   : > { %1862 = vperm.xlu1 %3287, %v1835_v4   ;;  %1859 = vperm.xlu0 %3286, %v1834_v35   ;;  %v5188_v4 = vld [vmem:[#allocation17_spill] sm:$0xff] }
  0x98   : > { %v5189_v35 = vld [vmem:[#allocation21_spill] sm:$0xff] }
  0x99   : > { %2994 = vmatpush3.bf16.xpose.msra.mxu1 %v2991_v34  ;;  %3090 = vmatpush3.bf16.xpose.msra.mxu0 %v3087_v22  ;;  %v1838_v22 = vsel %vm1751_vm9, 1, %v5180_v44  ;;  %v1841_v34 = vsel %vm1754_vm10, 1, %v5180_v44 }
  0x9a   : > { %2996 = vmatprep.subr.bf16.mxu1 %v2995_v14  ;;  %3092 = vmatprep.subr.bf16.mxu0 %v3091_v5 }
  0x9b   : > { %1868 = vperm.xlu1 %3287, %v1837_v12   ;;  %1865 = vperm.xlu0 %3286, %v1836_v27   ;;  %v5195_v12 = vld [vmem:[#allocation26_spill] sm:$0xff]  ;;  %v5196_v27 = vld [vmem:[#allocation27_spill] sm:$0xff] }
  0x9f   : > { %1687 = vperm.xlu1 %3287, %v1651_v19   ;;  %1684 = vperm.xlu0 %3286, %v1650_v21  }
  0xa1   : > { %2998 = vmatpush3.bf16.xpose.msra.mxu1 %v2995_v14  ;;  %3094 = vmatpush3.bf16.xpose.msra.mxu0 %v3091_v5  ;;  %v5190_v14 = vld [vmem:[#allocation18_spill] sm:$0xff] }
  0xa2   : > { %3000 = vmatprep.subr.bf16.mxu1 %v2999_v26  ;;  %3096 = vmatprep.subr.bf16.mxu0 %v3095_v6  ;;  %v5192_v5 = vld [vmem:[#allocation22_spill] sm:$0xff] }
  0xa3   : > { %1693 = vperm.xlu1 %3287, %v1653_v58   ;;  %1690 = vperm.xlu0 %3286, %v1652_v32  }
  0xa7   : > { %1874 = vperm.xlu1 %3287, %v1839_v2   ;;  %1871 = vperm.xlu0 %3286, %v1838_v22   ;;  %v4132_v2 = vld [vmem:[%s303_s24] ss:$0 sm:$0xff] }
  0xa9   : > { %3002 = vmatpush3.bf16.xpose.msra.mxu1 %v2999_v26  ;;  %3098 = vmatpush3.bf16.xpose.msra.mxu0 %v3095_v6 }
  0xaa   : > { %3004 = vmatprep.subr.bf16.mxu1 %v3708_v56  ;;  %3100 = vmatprep.subr.bf16.mxu0 %v3620_v10 }
  0xab   : > { %1880 = vperm.xlu1 %3287, %v1841_v34   ;;  %1877 = vperm.xlu0 %3286, %v1840_v43  }
  0xaf   : > { %1699 = vperm.xlu1 %3287, %v1655_v30   ;;  %1696 = vperm.xlu0 %3286, %v1654_v9  }
  0xb0   : > { %2692 = vmatmul.mubr.f32.vlgmr.msra.gmra.mrb[0].mxu1 %v3747_v7  ;;  %2860 = vmatmul.mubr.f32.vlgmr.msra.gmra.mrb[0].mxu0 %v3747_v7 }
  0xb1   : > { %3006 = vmatpush3.bf16.xpose.msra.mxu1 %v3708_v56  ;;  %3102 = vmatpush3.bf16.xpose.msra.mxu0 %v3620_v10  ;;  %v1740_v56 = vld [vmem:[%s3593_s0 + $0x68] sm:$0xff]  ;;  %v1739_v10 = vld [vmem:[%s3593_s0 + $0x60] sm:$0xff] }
  0xb2   : > { %3008 = vmatprep.subr.bf16.mxu1 %v3718_v60  ;;  %3104 = vmatprep.subr.bf16.mxu0 %v3626_v11  ;;  %vm1756_vm12 = vcmp.ne.s32.totalorder %v1740_v56, 0  ;;  %vm1755_vm13 = vcmp.ne.s32.totalorder %v1739_v10, 0 }
  0xb3   : > { %2694 = vmatprep.mubr.f32.mxu1 %v3754_v17  ;;  %2862 = vmatprep.mubr.f32.mxu0 %v3754_v17  ;;  %v1843_v55 = vsel %vm1756_vm12, 1, %v5180_v44  ;;  %v1842_v28 = vsel %vm1755_vm13, 1, %v5180_v44 }
  0xb4   : > { %2695 = vmatmul.mubr.f32.gmra.mrb[2].mxu1 %v3763_v23  ;;  %2863 = vmatmul.mubr.f32.gmra.mrb[2].mxu0 %v3763_v23 }
  0xb5   : > { %2697 = vmatprep.mubr.f32.mxu1 %v3767_v24  ;;  %2865 = vmatprep.mubr.f32.mxu0 %v3767_v24 }
  0xb6   : > { %1705 = vperm.xlu1 %3287, %v1657_v54   ;;  %1702 = vperm.xlu0 %3286, %v1656_v42  }
  0xb8   : > { %2698 = vmatmul.mubr.f32.gmra.mrb[4].mxu1 %v3785_v36  ;;  %2866 = vmatmul.mubr.f32.gmra.mrb[4].mxu0 %v3785_v36 }
  0xb9   : > { %3010 = vmatpush3.bf16.xpose.msra.mxu1 %v3718_v60  ;;  %3106 = vmatpush3.bf16.xpose.msra.mxu0 %v3626_v11  ;;  %v1742_v11 = vld [vmem:[%s3593_s0 + $0x78] sm:$0xff]  ;;  %v1741_v60 = vld [vmem:[%s3593_s0 + $0x70] sm:$0xff]  ;;  %s2405_s0 = sshll.u32 %s3438_s21, 7 }
  0xba   : > { %3012 = vmatprep.subr.bf16.mxu1 %v3727_v0  ;;  %3108 = vmatprep.subr.bf16.mxu0 %v3643_v20  ;;  %vm1758_vm14 = vcmp.ne.s32.totalorder %v1742_v11, 0  ;;  %vm1757_vm15 = vcmp.ne.s32.totalorder %v1741_v60, 0  ;;  %s1780_s28 = ssub.s32 %s2405_s0, %s2406_s23 }
  0xbb   : > { %2700 = vmatprep.mubr.f32.mxu1 %v3796_v61  ;;  %2868 = vmatprep.mubr.f32.mxu0 %v3796_v61  ;;  %v1845_v48 = vsel %vm1758_vm14, 1, %v5180_v44  ;;  %v1844_v41 = vsel %vm1757_vm15, 1, %v5180_v44  ;;  %v5186_v44 = vld [vmem:[#allocation14_spill] sm:$0xff]  ;;  %v4116_v6 = vstv %s1780_s28 }
  0xbc   : > { %2701 = vmatmul.mubr.f32.gmra.mrb[6].mxu1 %v3798_v62  ;;  %2869 = vmatmul.mubr.f32.gmra.mrb[6].mxu0 %v3798_v62 }
  0xbd   : > { %2703 = vmatprep.mubr.f32.mxu1 %v3808_v49  ;;  %2871 = vmatprep.mubr.f32.mxu0 %v3808_v49 }
  0xbe   : > { %1886 = vperm.xlu1 %3287, %v1843_v55   ;;  %1883 = vperm.xlu0 %3286, %v1842_v28  }
  0xc0   : > { %2704 = vmatmul.mubr.f32.gmra.mrb[8].mxu1 %v3828_v33  ;;  %2872 = vmatmul.mubr.f32.gmra.mrb[8].mxu0 %v3828_v33 }
  0xc1   : > { %3014 = vmatpush3.bf16.xpose.msra.mxu1 %v3727_v0  ;;  %3110 = vmatpush3.bf16.xpose.msra.mxu0 %v3643_v20  ;;  %v5184_v20 = vld [vmem:[#allocation19_spill] sm:$0xff]  ;;  %v5185_v0 = vld [vmem:[#allocation16_spill] sm:$0xff] }
  0xc2   : > { %3016 = vmatprep.subr.bf16.mxu1 %v3731_v1  ;;  %3112 = vmatprep.subr.bf16.mxu0 %v5181_v59 }
  0xc3   : > { %2706 = vmatprep.mubr.f32.mxu1 %v5182_v63  ;;  %2874 = vmatprep.mubr.f32.mxu0 %v5182_v63 }
  0xc4   : > { %2707 = vmatmul.mubr.f32.gmra.mrb[10].mxu1 %v5183_v18  ;;  %2875 = vmatmul.mubr.f32.gmra.mrb[10].mxu0 %v5183_v18 }
  0xc5   : > { %2709 = vmatprep.mubr.f32.mxu1 %v3854_v16  ;;  %2877 = vmatprep.mubr.f32.mxu0 %v3854_v16 }
  0xc6   : > { %1892 = vperm.xlu1 %3287, %v1845_v48   ;;  %1889 = vperm.xlu0 %3286, %v1844_v41   ;;  %v5255_v48 = vmov 0 }
  0xc8   : > { %2710 = vmatmul.mubr.f32.gmra.mrb[12].mxu1 %v3876_v3  ;;  %2878 = vmatmul.mubr.f32.gmra.mrb[12].mxu0 %v3876_v3 }
  0xc9   : > { %3018 = vmatpush3.bf16.xpose.msra.mxu1 %v3731_v1  ;;  %3114 = vmatpush3.bf16.xpose.msra.mxu0 %v5181_v59  ;;  %v5187_v1 = vld [vmem:[#allocation20_spill] sm:$0xff] }
  0xca   : > { %3020 = vmatprep.subr.bf16.mxu1 %v5184_v20  ;;  %3116 = vmatprep.subr.bf16.mxu0 %v5185_v0 }
  0xcb   : > { %2712 = vmatprep.mubr.f32.mxu1 %v3891_v38  ;;  %2880 = vmatprep.mubr.f32.mxu0 %v3891_v38 }
  0xcc   : > { %2713 = vmatmul.mubr.f32.gmra.mrb[14].mxu1 %v3900_v53  ;;  %2881 = vmatmul.mubr.f32.gmra.mrb[14].mxu0 %v3900_v53 }
  0xcd   : > { %2747 = vmatprep.mubr.f32.mxu1 %v5186_v44  ;;  %2915 = vmatprep.mubr.f32.mxu0 %v3635_v15  ;;  %v5191_v15 = vld [vmem:[#allocation24_spill] sm:$0xff] }
  0xd1   : > { %3022 = vmatpush3.bf16.xpose.msra.mxu1 %v5184_v20  ;;  %3118 = vmatpush3.bf16.xpose.msra.mxu0 %v5185_v0  ;;  %v5209_v20 = vmov 0 }
  0xd2   : > { %3024 = vmatprep.subr.bf16.mxu1 %v5187_v1  ;;  %3120 = vmatprep.subr.bf16.mxu0 %v5188_v4 }
  0xd9   : > { %3026 = vmatpush3.bf16.xpose.msra.mxu1 %v5187_v1  ;;  %3122 = vmatpush3.bf16.xpose.msra.mxu0 %v5188_v4  ;;  %v5213_v4 = vmov 0 }
  0xda   : > { %3028 = vmatprep.subr.bf16.mxu1 %v5189_v35  ;;  %3124 = vmatprep.subr.bf16.mxu0 %v5190_v14 }
  0xe1   : > { %3030 = vmatpush3.bf16.xpose.msra.mxu1 %v5189_v35  ;;  %3126 = vmatpush3.bf16.xpose.msra.mxu0 %v5190_v14 }
  0xe2   : > { %3032 = vmatprep.subr.bf16.mxu1 %v5191_v15  ;;  %3128 = vmatprep.subr.bf16.mxu0 %v5192_v5 }
  0xe9   : > { %3034 = vmatpush3.bf16.xpose.msra.mxu1 %v5191_v15  ;;  %3130 = vmatpush3.bf16.xpose.msra.mxu0 %v5192_v5  ;;  %v5215_v15 = vmov 0 }
  0xf0   : > { %2748 = vmatmul.mubr.f32.vlgmr.msra.gmra.mrb[0].mxu1 %v5193_v46  ;;  %2916 = vmatmul.mubr.f32.vlgmr.msra.gmra.mrb[0].mxu0 %v3747_v7  ;;  %v5198_v7 = vld [vmem:[#allocation30_spill] sm:$0xff] }
  0xf1   : > { %2750 = vmatprep.mubr.f32.mxu1 %v5194_v51  ;;  %2918 = vmatprep.mubr.f32.mxu0 %v3754_v17  ;;  %v5199_v17 = vld [vmem:[#allocation32_spill] sm:$0xff] }
  0xf4   : > { %2751 = vmatmul.mubr.f32.gmra.mrb[2].mxu1 %v5195_v12  ;;  %2919 = vmatmul.mubr.f32.gmra.mrb[2].mxu0 %v3763_v23  ;;  %v5200_v23 = vld [vmem:[#allocation33_spill] sm:$0xff] }
  0xf5   : > { %2753 = vmatprep.mubr.f32.mxu1 %v3790_v40  ;;  %2921 = vmatprep.mubr.f32.mxu0 %v3767_v24  ;;  %v1661_v24 = vpop.permute.xlu0 %1660 }
  0xf6   : > { %vm1711_vm1 = vcmp.eq.s32.totalorder %v1661_v24, %v4132_v2 }
  0xf7   : > { %vm4158_vm8 = vmxor %vm1711_vm1, %vm5137_vm7 }
  0xf8   : > { %2754 = vmatmul.mubr.f32.gmra.mrb[4].mxu1 %v5196_v27  ;;  %2922 = vmatmul.mubr.f32.gmra.mrb[4].mxu0 %v3785_v36 }
  0xf9   : > { %2756 = vmatprep.mubr.f32.mxu1 %v5197_v25  ;;  %2924 = vmatprep.mubr.f32.mxu0 %v3796_v61  ;;  %v1664_v36 = vpop.permute.xlu0 %1663 }
  0xfa   : > { %vm1712_vm5 = vcmp.eq.s32.totalorder %v1664_v36, %v4132_v2 }
  0xfb   : > { %vm4187_vm14 = vmxor %vm1712_vm5, %vm5137_vm7 }
  0xfc   : > { %2757 = vmatmul.mubr.f32.gmra.mrb[6].mxu1 %v3820_v47  ;;  %2925 = vmatmul.mubr.f32.gmra.mrb[6].mxu0 %v3798_v62 }
  0xfd   : > { %2759 = vmatprep.mubr.f32.mxu1 %v3835_v37  ;;  %2927 = vmatprep.mubr.f32.mxu0 %v3808_v49  ;;  %v4080_v37 = vpop.permute.xlu1 %1666  ;;  %v4084_v61 = vpop.permute.xlu0 %1672 }
 0x100   : > { %2760 = vmatmul.mubr.f32.gmra.mrb[8].mxu1 %v5198_v7  ;;  %2928 = vmatmul.mubr.f32.gmra.mrb[8].mxu0 %v3828_v33 }
 0x101   : > { %2762 = vmatprep.mubr.f32.mxu1 %v5199_v17  ;;  %2930 = vmatprep.mubr.f32.mxu0 %v5182_v63  ;;  %v1670_v33 = vpop.permute.xlu1 %1669 }
 0x102   : > { %vm1714_vm3 = vcmp.eq.s32.totalorder %v1670_v33, %v4132_v2 }
 0x103   : > { %vm4182_vm13 = vmxor %vm1714_vm3, %vm5137_vm7 }
 0x104   : > { %2763 = vmatmul.mubr.f32.gmra.mrb[10].mxu1 %v5200_v23  ;;  %2931 = vmatmul.mubr.f32.gmra.mrb[10].mxu0 %v5183_v18  ;;  %v5210_v20 = vsel %vm4182_vm13, 4294967295, %v5209_v20 }
 0x105   : > { %2765 = vmatprep.mubr.f32.mxu1 %v3885_v39  ;;  %2933 = vmatprep.mubr.f32.mxu0 %v3854_v16  ;;  %v4082_v40 = vpop.permute.xlu1 %1675  ;;  %v4088_v47 = vpop.permute.xlu0 %1678 }
 0x106   : > { %vm1716_vm10 = vcmp.eq.s32.totalorder %v4082_v40, %v4132_v2 }
 0x108   : > { %2766 = vmatmul.mubr.f32.gmra.mrb[12].mxu1 %v3898_v52  ;;  %2934 = vmatmul.mubr.f32.gmra.mrb[12].mxu0 %v3876_v3 }
 0x109   : > { %2768 = vmatprep.mubr.f32.mxu1 %v3909_v8  ;;  %2936 = vmatprep.mubr.f32.mxu0 %v3891_v38  ;;  %v4086_v62 = vpop.permute.xlu1 %1681 }
 0x10c   : > { %2769 = vmatmul.mubr.f32.gmra.mrb[14].mxu1 %v3918_v29  ;;  %2937 = vmatmul.mubr.f32.gmra.mrb[14].mxu0 %v3900_v53  ;;  %v1759_v29 = vlaneseq }
 0x10d   : > { %v4090_v49 = vpop.permute.xlu1 %1850  ;;  %v4092_v3 = vpop.permute.xlu0 %1847 }
 0x10e   : > { %v4110_v19 = vshrl.u32 %v1759_v29, 7  ;;  %v4120_v58 = vand.u32 127, %v1759_v29 }
 0x110   : > { %v1763_v45 = vadd.s32 24, %v4110_v19  ;;  %v1761_v57 = vadd.s32 8, %v4110_v19  ;;  %v1782_v32 = vadd.s32 %v4116_v6, %v4110_v19  ;;  %v1765_v50 = vadd.s32 40, %v4110_v19 }
 0x111   : > { %v1764_v22 = vadd.s32 32, %v4110_v19  ;;  %v1762_v9 = vadd.s32 16, %v4110_v19  ;;  %v1767_v42 = vadd.s32 56, %v4110_v19  ;;  %v1766_v10 = vadd.s32 48, %v4110_v19 }
 0x112   : > { %v4094_v16 = vpop.permute.xlu1 %1856  ;;  %v4096_v39 = vpop.permute.xlu0 %1853  ;;  %v1785_v34 = vadd.s32 %v4116_v6, %v1763_v45  ;;  %v1783_v43 = vadd.s32 %v4116_v6, %v1761_v57  ;;  %vm1798_vm0 = vcmp.ne.s32.totalorder %v1782_v32, %v4120_v58  ;;  %v1787_v54 = vadd.s32 %v4116_v6, %v1765_v50 }
 0x113   : > { %v1786_v56 = vadd.s32 %v4116_v6, %v1764_v22  ;;  %v1784_v28 = vadd.s32 %v4116_v6, %v1762_v9  ;;  %vm4153_vm6 = vmand %vm1711_vm1, %vm1798_vm0  ;;  %v1789_v59 = vadd.s32 %v4116_v6, %v1767_v42  ;;  %v1788_v18 = vadd.s32 %v4116_v6, %v1766_v10 }
 0x114   : > { %vm1801_vm2 = vcmp.ne.s32.totalorder %v1785_v34, %v4120_v58  ;;  %vm1799_vm4 = vcmp.ne.s32.totalorder %v1783_v43, %v4120_v58  ;;  %vm1803_vm9 = vcmp.ne.s32.totalorder %v1787_v54, %v4120_v58  ;;  %vm1715_vm0 = vcmp.eq.s32.totalorder %v4084_v61, %v4132_v2 }
 0x115   : > { %vm4170_vm11 = vmand %vm1714_vm3, %vm1801_vm2  ;;  %vm1802_vm15 = vcmp.ne.s32.totalorder %v1786_v56, %v4120_v58  ;;  %v1769_v44 = vadd.s32 72, %v4110_v19  ;;  %v1768_v1 = vadd.s32 64, %v4110_v19  ;;  %vm1800_vm1 = vcmp.ne.s32.totalorder %v1784_v28, %v4120_v58 }
 0x116   : > { %v4098_v38 = vpop.permute.xlu1 %1862  ;;  %v4100_v52 = vpop.permute.xlu0 %1859  ;;  %vm4174_vm12 = vmand %vm1712_vm5, %vm1799_vm4  ;;  %v1771_v35 = vadd.s32 88, %v4110_v19  ;;  %v1770_v14 = vadd.s32 80, %v4110_v19  ;;  %vm1805_vm5 = vcmp.ne.s32.totalorder %v1789_v59, %v4120_v58  ;;  %v1773_v61 = vadd.s32 104, %v4110_v19 }
 0x117   : > { %vm4204_vm3 = vmand %vm1716_vm10, %vm1803_vm9  ;;  %v4242_v27 = vadd.s32 %v4116_v6, %v1769_v44  ;;  %v4245_v25 = vadd.s32 %v4116_v6, %v1768_v1  ;;  %v1772_v29 = vadd.s32 96, %v4110_v19  ;;  %v5230_v50 = vmov 0 }
 0x118   : > { %v5214_v4 = vsel %vm4204_vm3, 4294967295, %v5213_v4  ;;  %vm4214_vm4 = vmxor %vm1716_vm10, %vm5137_vm7  ;;  %vm5219_vm3 = vcmp.eq.s32.totalorder %v4080_v37, %v4132_v2  ;;  %v4260_v23 = vadd.s32 %v4116_v6, %v1771_v35  ;;  %v4263_v24 = vadd.s32 %v4116_v6, %v1770_v14 }
 0x119   : > { %v5216_v15 = vsel %vm4214_vm4, 4294967295, %v5215_v15  ;;  %vm4223_vm2 = vmand %vm1715_vm0, %vm1802_vm15  ;;  %vm1895_vm4 = vcmp.eq.s32.totalorder %v4090_v49, 1  ;;  %vm5224_vm15 = vcmp.eq.s32.totalorder %v4086_v62, %v4132_v2  ;;  %v5232_v62 = vmov 0 }
 0x11a   : > { %v4102_v53 = vpop.permute.xlu1 %1868  ;;  %v4104_v8 = vpop.permute.xlu0 %1865  ;;  %vm4230_vm13 = vmand %vm5219_vm3, %vm1800_vm1  ;;  %v1775_v22 = vadd.s32 120, %v4110_v19  ;;  %v1774_v34 = vadd.s32 112, %v4110_v19  ;;  %v5235_v9 = vmov 0  ;;  %v5242_v54 = vmov 0 }
 0x11b   : > { %vm4235_vm10 = vmxor %vm1715_vm0, %vm5137_vm7  ;;  %v4356_v60 = vadd.s32 %v4116_v6, %v1773_v61  ;;  %v4359_v59 = vadd.s32 %v4116_v6, %v1772_v29 }
 0x11c   : > { %vm4252_vm1 = vmand %vm5224_vm15, %vm1805_vm5  ;;  %v4372_v44 = vadd.s32 %v4116_v6, %v1775_v22  ;;  %v4377_v35 = vadd.s32 %v4116_v6, %v1774_v34 }
 0x11d   : > { %vm5227_vm5 = vmmov %vm5224_vm15 }
 0x11e   : > { %v4106_v31 = vpop.permute.xlu1 %1687  ;;  %v4112_v21 = vpop.permute.xlu0 %1684  ;;  %vm4269_vm15 = vmxor %vm5227_vm5, %vm5137_vm7 }
 0x11f   : > { %vm4279_vm3 = vmand %vm4174_vm12, %vm1895_vm4  ;;  %vm5234_vm12 = vcmp.eq.s32.totalorder %v4080_v37, %v4132_v2 }
 0x120   : > { %v5231_v50 = vsel %vm4279_vm3, 4294967295, %v5230_v50  ;;  %vm4287_vm5 = vmand %vm4187_vm14, %vm1895_vm4  ;;  %vm5237_vm14 = vcmp.ne.s32.totalorder %v1788_v18, %v4120_v58  ;;  %vm5238_vm4 = vcmp.eq.s32.totalorder %v4088_v47, %v4132_v2 }
 0x121   : > { %v5233_v62 = vsel %vm4287_vm5, 4294967295, %v5232_v62  ;;  %vm4298_vm9 = vmxor %vm5234_vm12, %vm5137_vm7  ;;  %vm5244_vm12 = vcmp.eq.s32.totalorder %v4092_v3, 1 }
 0x122   : > { %v4114_v26 = vpop.permute.xlu1 %1693  ;;  %v4125_v13 = vpop.permute.xlu0 %1690  ;;  %v5236_v9 = vsel %vm4298_vm9, 4294967295, %v5235_v9  ;;  %vm4307_vm5 = vmand %vm5238_vm4, %vm5237_vm14  ;;  %vm5254_vm14 = vnez %v5210_v20 }
 0x123   : > { %vm5241_vm0 = vmmov %vm5238_vm4  ;;  %vm5250_vm4 = vcmp.eq.s32.totalorder %v4094_v16, 1  ;;  %v5258_v16 = vmov 0 }
 0x124   : > { %vm4315_vm3 = vmxor %vm5241_vm0, %vm5137_vm7 }
 0x125   : > { %v5243_v54 = vsel %vm4315_vm3, 4294967295, %v5242_v54  ;;  %vm4323_vm9 = vmand %vm4153_vm6, %vm5244_vm12  ;;  %vm1899_vm6 = vcmp.eq.s32.totalorder %v4098_v38, 1  ;;  %v5267_v38 = vmov 0 }
 0x126   : > { %v4137_v30 = vpop.permute.xlu1 %1874  ;;  %v4150_v55 = vpop.permute.xlu0 %1871  ;;  %vm5247_vm0 = vmmov %vm5244_vm12 }
 0x127   : > { %vm4337_vm7 = vmand %vm4158_vm8, %vm5247_vm0 }
 0x128   : > { %vm4350_vm3 = vmand %vm4170_vm11, %vm5250_vm4  ;;  %vm5260_vm11 = vnez %v5216_v15 }
 0x129   : > { %vm5253_vm0 = vmmov %vm5250_vm4  ;;  %vm5263_vm4 = vcmp.eq.s32.totalorder %v4100_v52, 1 }
 0x12a   : > { %v4166_v63 = vpop.permute.xlu1 %1880  ;;  %v4221_v5 = vpop.permute.xlu0 %1877  ;;  %vm4365_vm12 = vmand %vm5254_vm14, %vm5253_vm0  ;;  %vm5257_vm14 = vnez %v5214_v4  ;;  %v5264_v4 = vmov 0 }
 0x12b   : > { %v5256_v48 = vsel %vm4365_vm12, 4294967295, %v5255_v48  ;;  %vm4384_vm0 = vmand %vm5257_vm14, %vm1899_vm6 }
 0x12c   : > { %v5259_v16 = vsel %vm4384_vm0, 4294967295, %v5258_v16  ;;  %vm4392_vm8 = vmand %vm5260_vm11, %vm1899_vm6  ;;  %vm5287_vm11 = vcmp.eq.s32.totalorder %v4112_v21, %v4132_v2 }
 0x12d   : > { %vm4400_vm12 = vmand %vm4223_vm2, %vm5263_vm4  ;;  %vm5273_vm2 = vcmp.eq.s32.totalorder %v4096_v39, 1 }
 0x12e   : > { %v4247_v7 = vpop.permute.xlu1 %1699  ;;  %v4331_v42 = vpop.permute.xlu0 %1696  ;;  %v5265_v4 = vsel %vm4400_vm12, 4294967295, %v5264_v4  ;;  %vm5266_vm14 = vmmov %vm5263_vm4  ;;  %vm5269_vm4 = vcmp.ne.s32.totalorder %v4242_v27, %v4120_v58  ;;  %vm5270_vm12 = vcmp.eq.s32.totalorder %v4106_v31, %v4132_v2  ;;  %v5274_v27 = vmov 0 }
 0x12f   : > { %vm4408_vm0 = vmand %vm4235_vm10, %vm5266_vm14  ;;  %vm5286_vm14 = vcmp.ne.s32.totalorder %v4245_v25, %v4120_v58 }
 0x130   : > { %v5268_v38 = vsel %vm4408_vm0, 4294967295, %v5267_v38  ;;  %vm4422_vm10 = vmand %vm5270_vm12, %vm5269_vm4  ;;  %vm5276_vm12 = vmmov 1   ;;  %vm5277_vm4 = vcmp.eq.s32.totalorder %v4106_v31, %v4132_v2  ;;  %v5284_v31 = vmov 0 }
 0x131   : > { %vm4435_vm6 = vmand %vm4230_vm13, %vm5273_vm2  ;;  %vm5280_vm13 = vcmp.eq.s32.totalorder %v4102_v53, 1 }
 0x132   : > { %v5275_v27 = vsel %vm4435_vm6, 4294967295, %v5274_v27  ;;  %vm4443_vm0 = vmxor %vm5277_vm4, %vm5276_vm12 }
 0x133   : > { %vm4453_vm2 = vmand %vm4252_vm1, %vm5280_vm13  ;;  %vm5290_vm1 = vnez %v5231_v50 }
 0x134   : > { %vm5283_vm4 = vmmov %vm5280_vm13 }
 0x135   : > { %v4374_v1 = vpop.permute.xlu1 %1705  ;;  %vm4461_vm6 = vmand %vm4269_vm15, %vm5283_vm4  ;;  %vm5291_vm15 = vnez %v5233_v62 }
 0x136   : > { %v5285_v31 = vsel %vm4461_vm6, 4294967295, %v5284_v31  ;;  %vm5292_vm13 = vmmov %vm5287_vm11 }
 0x13d   : > { %v4497_v50 = vpop.permute.xlu1 %1886 }
 0x1c3   : > { %v2749_v33 = vpop.f32.mrb[0].mxu1  ;;  %v2917_v36 = vpop.f32.mrb[0].mxu0 }
 0x1c4   : > { %v3131_v45 = vadd.f32 %v2917_v36, %v2749_v33  ;;  %v938_v57 = vpop.f32.mrb[1].mxu1  ;;  %v1548_v32 = vpop.f32.mrb[1].mxu0 }
 0x1c5   : > { %v3132_v43 = vadd.f32 %v1548_v32, %v938_v57  ;;  %v5278_v57 = vmov 0 }
 0x1c6   : > { %v1959_v47 = vmul.f32 128.0, %v3131_v45  ;;  %v5279_v57 = vsel %vm4443_vm0, 4294967295, %v5278_v57  ;;  %vm4471_vm0 = vmand %vm5287_vm11, %vm5286_vm14 }
 0x1c7   : > { %v1958_v10 = vmul.f32 128.0, %v3132_v43  ;;  %v2752_v28 = vpop.f32.mrb[2].mxu1  ;;  %v2920_v11 = vpop.f32.mrb[2].mxu0  ;;  %vm4489_vm11 = vmxor %vm5292_vm13, %vm5276_vm12 }
 0x1c8   : > { %v3133_v41 = vadd.f32 %v2920_v11, %v2752_v28  ;;  %v952_v18 = vpop.f32.mrb[3].mxu1  ;;  %v1560_v0 = vpop.f32.mrb[3].mxu0  ;;  %v1975_v6 = vsub.f32 0.0, %v1959_v47  ;;  %v2007_v33 = vadd.f32 32.0, %v1959_v47 }
 0x1c9   : > { %v3134_v14 = vadd.f32 %v1560_v0, %v952_v18  ;;  %v1974_v15 = vsub.f32 0.0, %v1958_v10  ;;  %v2006_v61 = vadd.f32 32.0, %v1958_v10  ;;  %v4475_v43 = vpop.permute.xlu0 %1702 }
 0x1ca   : > { %v1961_v36 = vmul.f32 128.0, %v3133_v41  ;;  %v4479_v53 = vsel %vm5290_vm1, %v1975_v6, -1e+08  ;;  %v4483_v40 = vsel %vm5291_vm15, %v2007_v33, -1e+08  ;;  %vm5295_vm1 = vcmp.ne.s32.totalorder %v4260_v23, %v4120_v58 }
 0x1cb   : > { %v2755_v46 = vpop.f32.mrb[4].mxu1  ;;  %v4429_v12 = vmul.f32 128.0, %v3134_v14  ;;  %v2923_v29 = vpop.f32.mrb[4].mxu0  ;;  %v4501_v62 = vsel %vm4323_vm9, %v1974_v15, -1e+08  ;;  %vm5296_vm15 = vcmp.eq.s32.totalorder %v4114_v26, %v4132_v2  ;;  %v5297_v41 = vmov 0 }
 0x1cc   : > { %v966_v45 = vpop.f32.mrb[5].mxu1  ;;  %v1977_v32 = vsub.f32 0.0, %v1961_v36  ;;  %v3135_v22 = vadd.f32 %v2923_v29, %v2755_v46  ;;  %v1572_v34 = vpop.f32.mrb[5].mxu0  ;;  %v2009_v47 = vadd.f32 32.0, %v1961_v36  ;;  %v4505_v28 = vsel %vm4337_vm7, %v2006_v61, -1e+08  ;;  %vm4513_vm13 = vmand %vm5296_vm15, %vm5295_vm1 }
 0x1cd   : > { %v3136_v10 = vadd.f32 %v1572_v34, %v966_v45  ;;  %v5298_v41 = vsel %vm4513_vm13, 4294967295, %v5297_v41  ;;  %v1976_v37 = vsub.f32 0.0, %v4429_v12  ;;  %v4520_v56 = vadd.f32 32.0, %v4429_v12 }
 0x1ce   : > { %v1963_v21 = vmul.f32 128.0, %v3135_v22  ;;  %vm5299_vm7 = vcmp.eq.s32.totalorder %v4096_v39, 1  ;;  %vm5300_vm9 = vnez %v5236_v9  ;;  %vm5303_vm1 = vcmp.eq.s32.totalorder %v4104_v8, 1 }
 0x1cf   : > { %v2758_v11 = vpop.f32.mrb[6].mxu1  ;;  %v1962_v18 = vmul.f32 128.0, %v3136_v10  ;;  %v2926_v0 = vpop.f32.mrb[6].mxu0  ;;  %vm4526_vm14 = vmand %vm5300_vm9, %vm5299_vm7  ;;  %vm5307_vm13 = vnez %v5243_v54  ;;  %vm5310_vm7 = vcmp.eq.s32.totalorder %v4114_v26, %v4132_v2  ;;  %v4558_v8 = vsel %vm4350_vm3, %v1977_v32, -1e+08 }
 0x1d0   : > { %v980_v14 = vpop.f32.mrb[7].mxu1  ;;  %vm4534_vm15 = vmand %vm4307_vm5, %vm5303_vm1  ;;  %v1979_v49 = vsub.f32 0.0, %v1963_v21  ;;  %v2011_v54 = vadd.f32 32.0, %v1963_v21  ;;  %v3137_v33 = vadd.f32 %v2926_v0, %v2758_v11  ;;  %v1584_v36 = vpop.f32.mrb[7].mxu0  ;;  %v4717_v26 = vsel %vm4526_vm14, %v4520_v56, -1e+08 }
 0x1d1   : > { %vm5306_vm4 = vmmov %vm5303_vm1  ;;  %v1978_v3 = vsub.f32 0.0, %v1962_v18  ;;  %v2010_v61 = vadd.f32 32.0, %v1962_v18  ;;  %v3138_v46 = vadd.f32 %v1584_v36, %v980_v14  ;;  %v4638_v18 = vpop.permute.xlu1 %1892  ;;  %vm5361_vm14 = vcmp.eq.s32.totalorder %v4331_v42, %v4132_v2 }
 0x1d2   : > { %vm4542_vm6 = vmand %vm5307_vm13, %vm5306_vm4  ;;  %vm5313_vm4 = vcmp.ne.s32.totalorder %v4263_v24, %v4120_v58  ;;  %vm5314_vm13 = vcmp.eq.s32.totalorder %v4125_v13, %v4132_v2  ;;  %v4592_v12 = vsel %vm4392_vm8, %v2011_v54, -1e+08  ;;  %v1965_v29 = vmul.f32 128.0, %v3137_v33 }
 0x1d3   : > { %vm4550_vm9 = vmxor %vm5310_vm7, %vm5276_vm12  ;;  %vm5317_vm7 = vnez %v5256_v48  ;;  %v2761_v13 = vpop.f32.mrb[8].mxu1  ;;  %vm5326_vm8 = vnez %v5268_v38  ;;  %v2929_v34 = vpop.f32.mrb[8].mxu0  ;;  %v1964_v14 = vmul.f32 128.0, %v3138_v46 }
 0x1d4   : > { %vm4566_vm1 = vmand %vm5314_vm13, %vm5313_vm4  ;;  %v4572_v15 = vsel %vm5317_vm7, %v2009_v47, -1e+08  ;;  %vm5321_vm7 = vnez %v5259_v16  ;;  %v2146_v16 = vmax.f32 %v4483_v40, %v4592_v12  ;;  %v4612_v22 = vsel %vm5326_vm8, %v2010_v61, -1e+08  ;;  %v994_v52 = vpop.f32.mrb[9].mxu1  ;;  %v1596_v11 = vpop.f32.mrb[9].mxu0 }
 0x1d5   : > { %vm5318_vm3 = vmmov %vm5314_vm13  ;;  %v4588_v48 = vsel %vm5321_vm7, %v1979_v49, -1e+08  ;;  %vm5325_vm7 = vnez %v5265_v4  ;;  %v2145_v38 = vmax.f32 %v4505_v28, %v4612_v22  ;;  %v1981_v10 = vsub.f32 0.0, %v1965_v29 }
 0x1d6   : > { %vm4578_vm5 = vmxor %vm5318_vm3, %vm5276_vm12  ;;  %vm5322_vm3 = vcmp.eq.s32.totalorder %v4137_v30, 1  ;;  %v2040_v32 = vmax.f32 %v4479_v53, %v4588_v48  ;;  %v4608_v20 = vsel %vm5325_vm7, %v1978_v3, -1e+08  ;;  %v2013_v21 = vadd.f32 32.0, %v1965_v29 }
 0x1d7   : > { %vm4598_vm12 = vmand %vm4422_vm10, %vm5322_vm3  ;;  %v2039_v4 = vmax.f32 %v4501_v62, %v4608_v20  ;;  %vm5331_vm7 = vcmp.eq.s32.totalorder %v4150_v55, 1  ;;  %v5332_v30 = vmov 0  ;;  %v3139_v49 = vadd.f32 %v2929_v34, %v2761_v13  ;;  %v2764_v25 = vpop.f32.mrb[10].mxu1 }
 0x1d8   : > { %vm5327_vm10 = vmmov %vm5322_vm3  ;;  %vm5328_vm3 = vnez %v5279_v57  ;;  %v4636_v57 = vpop.permute.xlu0 %1883  ;;  %v3140_v54 = vadd.f32 %v1596_v11, %v994_v52  ;;  %v1980_v3 = vsub.f32 0.0, %v1964_v14  ;;  %v1008_v61 = vpop.f32.mrb[11].mxu1 }
 0x1d9   : > { %vm4618_vm13 = vmand %vm5328_vm3, %vm5327_vm10  ;;  %vm5334_vm10 = vnez %v5275_v27  ;;  %v4659_v27 = vsel %vm4453_vm2, %v1981_v10, -1e+08  ;;  %v1967_v29 = vmul.f32 128.0, %v3139_v49 }
 0x1da   : > { %vm4632_vm8 = vmand %vm4471_vm0, %vm5331_vm7  ;;  %v4642_v0 = vsel %vm5334_vm10, %v1976_v37, -1e+08  ;;  %v2932_v37 = vpop.f32.mrb[10].mxu0  ;;  %v1966_v13 = vmul.f32 128.0, %v3140_v54  ;;  %v4721_v24 = vsel %vm4534_vm15, %v1980_v3, -1e+08 }
 0x1db   : > { %v5333_v30 = vsel %vm4632_vm8, 4294967295, %v5332_v30  ;;  %vm5335_vm3 = vmmov %vm5331_vm7  ;;  %vm5338_vm8 = vnez %v5285_v31  ;;  %v2042_v31 = vmax.f32 %v4558_v8, %v4659_v27  ;;  %v1608_v46 = vpop.f32.mrb[11].mxu0  ;;  %v3141_v34 = vadd.f32 %v2932_v37, %v2764_v25 }
 0x1dc   : > { %vm4648_vm4 = vmand %vm4489_vm11, %vm5335_vm3  ;;  %v4663_v55 = vsel %vm5338_vm8, %v2013_v21, -1e+08  ;;  %vm5339_vm11 = vcmp.eq.s32.totalorder %v4166_v63, 1  ;;  %vm5340_vm3 = vnez %v5298_v41  ;;  %v2012_v41 = vadd.f32 32.0, %v1964_v14  ;;  %v2767_v21 = vpop.f32.mrb[12].mxu1  ;;  %v2935_v11 = vpop.f32.mrb[12].mxu0 }
 0x1dd   : > { %vm4669_vm0 = vmand %vm5340_vm3, %vm5339_vm11  ;;  %v2148_v36 = vmax.f32 %v4572_v15, %v4663_v55  ;;  %vm5346_vm8 = vcmp.eq.s32.totalorder %v4221_v5, 1  ;;  %v3142_v52 = vadd.f32 %v1608_v46, %v1008_v61  ;;  %v2041_v56 = vmax.f32 %v4642_v0, %v4721_v24  ;;  %v1022_v37 = vpop.f32.mrb[13].mxu1  ;;  %v1620_v3 = vpop.f32.mrb[13].mxu0 }
 0x1de   : > { %vm5343_vm10 = vmmov %vm5339_vm11  ;;  %v1983_v6 = vsub.f32 0.0, %v1967_v29  ;;  %v2015_v39 = vadd.f32 32.0, %v1967_v29  ;;  %v1982_v14 = vsub.f32 0.0, %v1966_v13  ;;  %v2014_v49 = vadd.f32 32.0, %v1966_v13 }
 0x1df   : > { %vm4677_vm2 = vmand %vm4550_vm9, %vm5343_vm10  ;;  %v1969_v54 = vmul.f32 128.0, %v3141_v34  ;;  %v1968_v25 = vmul.f32 128.0, %v3142_v52  ;;  %v3143_v46 = vadd.f32 %v2935_v11, %v2767_v21  ;;  %v3144_v29 = vadd.f32 %v1620_v3, %v1022_v37  ;;  %v2770_v52 = vpop.f32.mrb[14].mxu1 }
 0x1e0   : > { %vm4689_vm11 = vmand %vm4566_vm1, %vm5346_vm8  ;;  %vm5352_vm1 = vcmp.ne.s32.totalorder %v4356_v60, %v4120_v58  ;;  %v4725_v60 = vsel %vm4542_vm6, %v2012_v41, -1e+08  ;;  %vm5360_vm6 = vcmp.ne.s32.totalorder %v4359_v59, %v4120_v58  ;;  %v4760_v59 = vsel %vm4598_vm12, %v1983_v6, -1e+08  ;;  %v2938_v6 = vpop.f32.mrb[14].mxu0 }
 0x1e1   : > { %vm5349_vm9 = vmmov %vm5346_vm8  ;;  %vm5353_vm8 = vcmp.eq.s32.totalorder %v4247_v7, %v4132_v2  ;;  %v2147_v23 = vmax.f32 %v4717_v26, %v4725_v60  ;;  %v4764_v61 = vsel %vm4618_vm13, %v2015_v39, -1e+08  ;;  %v2044_v45 = vmax.f32 %v2040_v32, %v4760_v59 }
 0x1e2   : > { %vm4697_vm10 = vmand %vm4578_vm5, %vm5349_vm9  ;;  %vm1725_vm5 = vcmp.eq.s32.totalorder %v4475_v43, %v4132_v2  ;;  %vm5356_vm9 = vmmov 1   ;;  %v2150_v47 = vmax.f32 %v2146_v16, %v4764_v61  ;;  %vm5371_vm12 = vnez %v5333_v30  ;;  %v1890_v43 = vpop.permute.xlu0 %1889 }
 0x1e3   : > { %vm4708_vm7 = vmand %vm5353_vm8, %vm5352_vm1  ;;  %v4790_v13 = vsel %vm4648_vm4, %v2014_v49, -1e+08  ;;  %v1985_v30 = vsub.f32 0.0, %v1969_v54  ;;  %v2017_v17 = vadd.f32 32.0, %v1969_v54  ;;  %vm5375_vm4 = vcmp.ne.s32.totalorder %v4377_v35, %v4120_v58 }
 0x1e4   : > { %vm5357_vm1 = vmmov %vm5353_vm8  ;;  %v2149_v16 = vmax.f32 %v2145_v38, %v4790_v13  ;;  %v2016_v39 = vadd.f32 32.0, %v1968_v25  ;;  %v1971_v21 = vmul.f32 128.0, %v3143_v46  ;;  %v1970_v11 = vmul.f32 128.0, %v3144_v29  ;;  %v1632_v38 = vpop.f32.mrb[15].mxu0 }
 0x1e5   : > { %vm4731_vm8 = vmxor %vm5357_vm1, %vm5356_vm9  ;;  %v4832_v35 = vsel %vm4677_vm2, %v2017_v17, -1e+08  ;;  %v3145_v54 = vadd.f32 %v2938_v6, %v2770_v52  ;;  %vm5384_vm2 = vcmp.eq.s32.totalorder %v4636_v57, 1 }
 0x1e6   : > { %vm4746_vm15 = vmand %vm5361_vm14, %vm5360_vm6  ;;  %vm5367_vm6 = vcmp.ne.s32.totalorder %v4372_v44, %v4120_v58  ;;  %v4786_v44 = vsel %vm5371_vm12, %v1982_v14, -1e+08  ;;  %v1036_v14 = vpop.f32.mrb[15].mxu1  ;;  %v4828_v58 = vsel %vm4669_vm0, %v1985_v30, -1e+08  ;;  %v2152_v51 = vmax.f32 %v2148_v36, %v4832_v35 }
 0x1e7   : > { %vm5364_vm1 = vmmov %vm5361_vm14  ;;  %vm5368_vm14 = vcmp.eq.s32.totalorder %v4374_v1, %v4132_v2  ;;  %v2043_v32 = vmax.f32 %v2039_v4, %v4786_v44  ;;  %v1984_v4 = vsub.f32 0.0, %v1968_v25  ;;  %v3146_v25 = vadd.f32 %v1632_v38, %v1036_v14 }
 0x1e8   : > { %vm4754_vm3 = vmxor %vm5364_vm1, %vm5356_vm9  ;;  %v2046_v33 = vmax.f32 %v2042_v31, %v4828_v58  ;;  %v4856_v5 = vsel %vm4697_vm10, %v2016_v39, -1e+08  ;;  %v1987_v46 = vsub.f32 0.0, %v1971_v21  ;;  %v2019_v29 = vadd.f32 32.0, %v1971_v21 }
 0x1e9   : > { %vm4772_vm1 = vmand %vm5368_vm14, %vm5367_vm6  ;;  %v4852_v37 = vsel %vm4689_vm11, %v1984_v4, -1e+08  ;;  %v2151_v3 = vmax.f32 %v2147_v23, %v4856_v5  ;;  %v1986_v36 = vsub.f32 0.0, %v1970_v11  ;;  %v2018_v63 = vadd.f32 32.0, %v1970_v11 }
 0x1ea   : > { %vm5372_vm13 = vmmov %vm5368_vm14  ;;  %v2045_v31 = vmax.f32 %v2041_v56, %v4852_v37  ;;  %v1973_v9 = vmul.f32 128.0, %v3145_v54  ;;  %v1972_v30 = vmul.f32 128.0, %v3146_v25  ;;  %v4918_v56 = vld [vmem:[#allocation2] sm:$0x1] }
 0x1eb   : > { %vm4796_vm6 = vmxor %vm5372_vm13, %vm5356_vm9  ;;  %vm5380_vm13 = vcmp.eq.s32.totalorder %v4497_v50, 1 }
 0x1ec   : > { %vm4814_vm14 = vmand %vm1725_vm5, %vm5375_vm4  ;;  %v1989_v52 = vsub.f32 0.0, %v1973_v9  ;;  %v2021_v6 = vadd.f32 32.0, %v1973_v9 }
 0x1ed   : > { %vm4822_vm12 = vmxor %vm1725_vm5, %vm5356_vm9  ;;  %vm1908_vm9 = vcmp.eq.s32.totalorder %v1890_v43, 1 }
 0x1ee   : > { %vm4838_vm4 = vmand %vm4708_vm7, %vm5380_vm13 }
 0x1ef   : > { %vm5383_vm0 = vmmov %vm5380_vm13  ;;  %v4874_v50 = vsel %vm4838_vm4, %v1987_v46, -1e+08 }
 0x1f0   : > { %vm1955_vm7 = vmand %vm4731_vm8, %vm5383_vm0  ;;  %vm5386_vm8 = vcmp.eq.s32.totalorder %v4638_v18, 1  ;;  %v2048_v57 = vmax.f32 %v2044_v45, %v4874_v50  ;;  %v1988_v45 = vsub.f32 0.0, %v1972_v30 }
 0x1f1   : > { %vm1922_vm11 = vmand %vm4746_vm15, %vm5384_vm2  ;;  %v4876_v10 = vsel %vm1955_vm7, %v2019_v29, -1e+08 }
 0x1f2   : > { %vm5385_vm10 = vmmov %vm5384_vm2  ;;  %v2154_v23 = vmax.f32 %v2150_v47, %v4876_v10  ;;  %v4888_v7 = vsel %vm1922_vm11, %v1986_v36, -1e+08  ;;  %v2020_v47 = vadd.f32 32.0, %v1972_v30 }
 0x1f3   : > { %vm1954_vm5 = vmand %vm4754_vm3, %vm5385_vm10  ;;  %v2047_v17 = vmax.f32 %v2043_v32, %v4888_v7 }
 0x1f4   : > { %vm4882_vm15 = vmand %vm4772_vm1, %vm5386_vm8  ;;  %v4890_v41 = vsel %vm1954_vm5, %v2018_v63, -1e+08 }
 0x1f5   : > { %vm5389_vm3 = vmmov %vm5386_vm8  ;;  %v2153_v42 = vmax.f32 %v2149_v16, %v4890_v41  ;;  %v2051_v18 = vmax.f32 %v2047_v17, %v2048_v57  ;;  %v4906_v34 = vsel %vm4882_vm15, %v1989_v52, -1e+08  ;;  %v4920_v57 = vld [vmem:[#allocation4] sm:$0x1] }
 0x1f6   : > { %vm1957_vm13 = vmand %vm4796_vm6, %vm5389_vm3  ;;  %v2050_v16 = vmax.f32 %v2046_v33, %v4906_v34 }
 0x1f7   : > { %vm1924_vm1 = vmand %vm4814_vm14, %vm1908_vm9  ;;  %v2157_v4 = vmax.f32 %v2153_v42, %v2154_v23  ;;  %v4908_v32 = vsel %vm1957_vm13, %v2021_v6, -1e+08 }
 0x1f8   : > { %vm1956_vm4 = vmand %vm4822_vm12, %vm1908_vm9  ;;  %v2156_v39 = vmax.f32 %v2152_v51, %v4908_v32  ;;  %v4912_v1 = vsel %vm1924_vm1, %v1988_v45, -1e+08 }
 0x1f9   : > { %v4914_v21 = vsel %vm1956_vm4, %v2020_v47, -1e+08  ;;  %v2049_v11 = vmax.f32 %v2045_v31, %v4912_v1 }
 0x1fa   : > { %v2155_v14 = vmax.f32 %v2151_v3, %v4914_v21  ;;  %v2069_v3 = vsub.s32 0, %v4110_v19 }
 0x1fb   : > { %v2052_v38 = vmax.f32 %v2049_v11, %v2050_v16 }
 0x1fc   : > { %v2158_v49 = vmax.f32 %v2155_v14, %v2156_v39 }
 0x1fd   : > { %v2053_v54 = vmax.f32 %v2051_v18, %v2052_v38 }
 0x1fe   : > { %v2159_v25 = vmax.f32 %v2157_v4, %v2158_v49 }
 0x1ff   : > { %v2054_v2 = vrot.slane %v2053_v54, 4 }
 0x200   : > { %v2160_v43 = vrot.slane %v2159_v25, 4 }
 0x201   : > { %v2055_v46 = vmax.f32 %v2053_v54, %v2054_v2 }
 0x202   : > { %v2161_v29 = vmax.f32 %v2159_v25, %v2160_v43 }
 0x203   : > { %v2056_v36 = vrot.slane %v2055_v46, 2 }
 0x204   : > { %v2162_v33 = vrot.slane %v2161_v29, 2 }
 0x205   : > { %v2057_v63 = vmax.f32 %v2055_v46, %v2056_v36 }
 0x206   : > { %v2163_v51 = vmax.f32 %v2161_v29, %v2162_v33 }
 0x207   : > { %v2058_v9 = vrot.slane %v2057_v63, 1 }
 0x208   : > { %v2164_v30 = vrot.slane %v2163_v51, 1 }
 0x209   : > { %v2059_v31 = vmax.f32 %v2057_v63, %v2058_v9 }
 0x20a   : > { %v2165_v23 = vmax.f32 %v2163_v51, %v2164_v30 }
 0x20b   : > { %v4924_v17 = vmax.f32 %v4918_v56, %v2059_v31 }
 0x20c   : > { %v4927_v42 = vmax.f32 %v4920_v57, %v2165_v23 }
 0x20d   : > { %v4930_v52 = vrot.slane %v4924_v17, %v2069_v3  ;;  %2143 = vst [vmem:[#allocation2] sm:$0x1] %v4924_v17 }
 0x20e   : > { %v2168_v6 = vsub.f32 %v4920_v57, %v4927_v42  ;;  %2249 = vst [vmem:[#allocation4] sm:$0x1] %v4927_v42  ;;  %v4943_v18 = vrot.slane %v4927_v42, %v2069_v3 }
 0x20f   : > { %v2072_v19 = vsub.f32 %v4501_v62, %v4930_v52  ;;  %v2073_v45 = vsub.f32 %v4479_v53, %v4930_v52  ;;  %v2074_v47 = vsub.f32 %v4642_v0, %v4930_v52  ;;  %v2075_v4 = vsub.f32 %v4558_v8, %v4930_v52 }
 0x210   : > { %v2076_v16 = vsub.f32 %v4608_v20, %v4930_v52  ;;  %v2077_v39 = vsub.f32 %v4588_v48, %v4930_v52  ;;  %v2078_v62 = vsub.f32 %v4721_v24, %v4930_v52  ;;  %v2079_v53 = vsub.f32 %v4659_v27, %v4930_v52 }
 0x211   : > { %v2080_v0 = vsub.f32 %v4786_v44, %v4930_v52  ;;  %v2081_v11 = vsub.f32 %v4760_v59, %v4930_v52  ;;  %v2082_v8 = vsub.f32 %v4852_v37, %v4930_v52  ;;  %v2083_v20 = vsub.f32 %v4828_v58, %v4930_v52 }
 0x212   : > { %v2084_v48 = vsub.f32 %v4888_v7, %v4930_v52  ;;  %v2085_v24 = vsub.f32 %v4874_v50, %v4930_v52  ;;  %v2086_v27 = vsub.f32 %v4912_v1, %v4930_v52  ;;  %v2087_v44 = vsub.f32 %v4906_v34, %v4930_v52 }
 0x213   : > { %v2088_v14 = vmul.f32 1.442695, %v2072_v19  ;;  %v2090_v59 = vmul.f32 1.442695, %v2073_v45  ;;  %v2092_v38 = vmul.f32 1.442695, %v2074_v47  ;;  %v2178_v37 = vsub.f32 %v4505_v28, %v4943_v18 }
 0x214   : > { %v2094_v58 = vmul.f32 1.442695, %v2075_v4  ;;  %v2096_v7 = vmul.f32 1.442695, %v2076_v16  ;;  %v2098_v49 = vmul.f32 1.442695, %v2077_v39  ;;  %v2179_v54 = vsub.f32 %v4483_v40, %v4943_v18 }
 0x215   : > { %3288 = vpow2.f32 %v2088_v14  ;;  %v2180_v25 = vsub.f32 %v4717_v26, %v4943_v18  ;;  %v2181_v2 = vsub.f32 %v4572_v15, %v4943_v18  ;;  %v2182_v43 = vsub.f32 %v4612_v22, %v4943_v18 }
 0x216   : > { %3290 = vpow2.f32 %v2090_v59  ;;  %v2183_v28 = vsub.f32 %v4592_v12, %v4943_v18  ;;  %v2184_v46 = vsub.f32 %v4725_v60, %v4943_v18  ;;  %v2185_v29 = vsub.f32 %v4663_v55, %v4943_v18 }
 0x217   : > { %3292 = vpow2.f32 %v2092_v38  ;;  %v2186_v40 = vsub.f32 %v4790_v13, %v4943_v18  ;;  %v2187_v26 = vsub.f32 %v4764_v61, %v4943_v18  ;;  %v2100_v15 = vmul.f32 1.442695, %v2078_v62 }
 0x218   : > { %3294 = vpow2.f32 %v2094_v58  ;;  %v2188_v22 = vsub.f32 %v4856_v5, %v4943_v18  ;;  %v2189_v12 = vsub.f32 %v4832_v35, %v4943_v18  ;;  %v2190_v60 = vsub.f32 %v4890_v41, %v4943_v18 }
 0x219   : > { %3296 = vpow2.f32 %v2096_v7  ;;  %v2191_v55 = vsub.f32 %v4876_v10, %v4943_v18  ;;  %v2192_v36 = vsub.f32 %v4914_v21, %v4943_v18  ;;  %v2102_v33 = vmul.f32 1.442695, %v2079_v53 }
 0x21a   : > { %3298 = vpow2.f32 %v2098_v49  ;;  %v2193_v63 = vsub.f32 %v4908_v32, %v4943_v18  ;;  %v2104_v30 = vmul.f32 1.442695, %v2080_v0  ;;  %v2106_v31 = vmul.f32 1.442695, %v2081_v11 }
 0x21b   : > { %3300 = vpow2.f32 %v2100_v15  ;;  %v2194_v19 = vmul.f32 1.442695, %v2178_v37  ;;  %v2196_v47 = vmul.f32 1.442695, %v2179_v54  ;;  %v2108_v16 = vmul.f32 1.442695, %v2082_v8 }
 0x21c   : > { %3302 = vpow2.f32 %v2102_v33  ;;  %v2198_v62 = vmul.f32 1.442695, %v2180_v25  ;;  %v2110_v14 = vmul.f32 1.442695, %v2083_v20  ;;  %v2200_v38 = vmul.f32 1.442695, %v2181_v2 }
 0x21d   : > { %3304 = vpow2.f32 %v2104_v30  ;;  %v2112_v11 = vmul.f32 1.442695, %v2084_v48  ;;  %v2202_v37 = vmul.f32 1.442695, %v2182_v43  ;;  %v2114_v8 = vmul.f32 1.442695, %v2085_v24 }
 0x21e   : > { %3306 = vpow2.f32 %v2106_v31  ;;  %v2204_v54 = vmul.f32 1.442695, %v2183_v28  ;;  %v2116_v25 = vmul.f32 1.442695, %v2086_v27  ;;  %v2206_v48 = vmul.f32 1.442695, %v2184_v46 }
 0x21f   : > { %v3289_v51 = vpop.eup %3288  ;;  %3308 = vpow2.f32 %v2194_v19  ;;  %v2118_v43 = vmul.f32 1.442695, %v2087_v44  ;;  %v2208_v33 = vmul.f32 1.442695, %v2185_v29  ;;  %v2210_v1 = vmul.f32 1.442695, %v2186_v40 }
 0x220   : > { %v3291_v9 = vpop.eup %3290  ;;  %3310 = vpow2.f32 %v2196_v47  ;;  %v2212_v34 = vmul.f32 1.442695, %v2187_v26  ;;  %v2062_v44 = vsub.f32 %v4918_v56, %v4924_v17  ;;  %v2214_v13 = vmul.f32 1.442695, %v2188_v22 }
 0x221   : > { %v2120_v3 = vadd.f32 %v3291_v9, %v3289_v51  ;;  %v3293_v23 = vpop.eup %3292  ;;  %3312 = vpow2.f32 %v2108_v16  ;;  %v2216_v61 = vmul.f32 1.442695, %v2189_v12  ;;  %v2218_v5 = vmul.f32 1.442695, %v2190_v60 }
 0x222   : > { %v3295_v4 = vpop.eup %3294  ;;  %3314 = vpow2.f32 %v2198_v62  ;;  %v2220_v35 = vmul.f32 1.442695, %v2191_v55  ;;  %v2222_v41 = vmul.f32 1.442695, %v2192_v36 }
 0x223   : > { %v2121_v45 = vadd.f32 %v3293_v23, %v2120_v3  ;;  %v3297_v53 = vpop.eup %3296  ;;  %3316 = vpow2.f32 %v2110_v14 }
 0x224   : > { %v3299_v0 = vpop.eup %3298  ;;  %3318 = vpow2.f32 %v2200_v38 }
 0x225   : > { %v2122_v39 = vadd.f32 %v3295_v4, %v2121_v45  ;;  %v3301_v7 = vpop.eup %3300  ;;  %3320 = vpow2.f32 %v2112_v11  ;;  %v2063_v4 = vmul.f32 1.442695, %v2062_v44 }
 0x226   : > { %v3303_v20 = vpop.eup %3302  ;;  %3322 = vpow2.f32 %v2202_v37 }
 0x227   : > { %v2123_v59 = vadd.f32 %v3297_v53, %v2122_v39  ;;  %v3305_v15 = vpop.eup %3304  ;;  %3324 = vpow2.f32 %v2114_v8 }
 0x228   : > { %v3307_v50 = vpop.eup %3306  ;;  %3326 = vpow2.f32 %v2204_v54 }
 0x229   : > { %v2124_v58 = vadd.f32 %v3299_v0, %v2123_v59  ;;  %v3309_v28 = vpop.eup %3308  ;;  %3328 = vpow2.f32 %v2116_v25  ;;  %v2061_v25 = vld [vmem:[#allocation3] sm:$0x1] }
 0x22a   : > { %v3311_v51 = vpop.eup %3310  ;;  %3330 = vpow2.f32 %v2206_v48 }
 0x22b   : > { %v2125_v49 = vadd.f32 %v3301_v7, %v2124_v58  ;;  %v3313_v27 = vpop.eup %3312  ;;  %3332 = vpow2.f32 %v2118_v43  ;;  %v2226_v46 = vadd.f32 %v3311_v51, %v3309_v28  ;;  %v2224_v58 = vmul.f32 1.442695, %v2193_v63 }
 0x22c   : > { %v3315_v30 = vpop.eup %3314  ;;  %3334 = vpow2.f32 %v2208_v33  ;;  %v2169_v63 = vmul.f32 1.442695, %v2168_v6 }
 0x22d   : > { %v2126_v2 = vadd.f32 %v3303_v20, %v2125_v49  ;;  %v3317_v52 = vpop.eup %3316  ;;  %v2227_v29 = vadd.f32 %v3315_v30, %v2226_v46  ;;  %3336 = vpow2.f32 %v2210_v1 }
 0x22e   : > { %v3319_v3 = vpop.eup %3318  ;;  %3338 = vpow2.f32 %v2212_v34 }
 0x22f   : > { %v2127_v24 = vadd.f32 %v3305_v15, %v2126_v2  ;;  %v3321_v40 = vpop.eup %3320  ;;  %v2228_v19 = vadd.f32 %v3319_v3, %v2227_v29  ;;  %3340 = vpow2.f32 %v2214_v13  ;;  %v2254_v13 = vld [vmem:[#allocation2] sm:$0x1] (!%p2407_p2) }
 0x230   : > { %v3323_v45 = vpop.eup %3322  ;;  %3342 = vpow2.f32 %v2216_v61 }
 0x231   : > { %v2128_v9 = vadd.f32 %v3307_v50, %v2127_v24  ;;  %v3325_v26 = vpop.eup %3324  ;;  %v2229_v56 = vadd.f32 %v3323_v45, %v2228_v19  ;;  %3344 = vpow2.f32 %v2063_v4  ;;  %v2259_v45 = vld [vmem:[#allocation4] sm:$0x1] (!%p2407_p2) }
 0x232   : > { %v3327_v17 = vpop.eup %3326  ;;  %3346 = vpow2.f32 %v2218_v5 }
 0x233   : > { %v2129_v31 = vadd.f32 %v3313_v27, %v2128_v9  ;;  %v3329_v22 = vpop.eup %3328  ;;  %v2230_v39 = vadd.f32 %v3327_v17, %v2229_v56  ;;  %3348 = vpow2.f32 %v2220_v35 }
 0x234   : > { %v3331_v62 = vpop.eup %3330  ;;  %3350 = vpow2.f32 %v2222_v41 }
 0x235   : > { %v2130_v23 = vadd.f32 %v3317_v52, %v2129_v31  ;;  %v3333_v12 = vpop.eup %3332  ;;  %v2231_v14 = vadd.f32 %v3331_v62, %v2230_v39  ;;  %3352 = vpow2.f32 %v2224_v58  ;;  %v2167_v52 = vld [vmem:[#allocation5] sm:$0x1] }
 0x236   : > { %v3335_v59 = vpop.eup %3334  ;;  %3354 = vpow2.f32 %v2169_v63 }
 0x237   : > { %v2131_v47 = vadd.f32 %v3321_v40, %v2130_v23  ;;  %v2232_v60 = vadd.f32 %v3335_v59, %v2231_v14  ;;  %v3337_v0 = vpop.eup %3336 }
 0x238   : > { %v3339_v55 = vpop.eup %3338 }
 0x239   : > { %v2132_v16 = vadd.f32 %v3325_v26, %v2131_v47  ;;  %v2233_v10 = vadd.f32 %v3337_v0, %v2232_v60  ;;  %v3341_v8 = vpop.eup %3340 }
 0x23a   : > { %v3343_v20 = vpop.eup %3342 }
 0x23b   : > { %v2133_v53 = vadd.f32 %v3329_v22, %v2132_v16  ;;  %v2234_v7 = vadd.f32 %v3339_v55, %v2233_v10  ;;  %v3345_v36 = vpop.eup %3344 }
 0x23c   : > { %v3347_v48 = vpop.eup %3346  ;;  %v2065_v32 = vmul.f32 %v3345_v36, %v2061_v25 }
 0x23d   : > { %v2134_v38 = vadd.f32 %v3333_v12, %v2133_v53  ;;  %v2235_v54 = vadd.f32 %v3341_v8, %v2234_v7  ;;  %v3349_v50 = vpop.eup %3348 }
 0x23e   : > { %v3351_v33 = vpop.eup %3350 }
 0x23f   : > { %v2135_v11 = vrot.slane %v2134_v38, 4  ;;  %v2236_v2 = vadd.f32 %v3343_v20, %v2235_v54  ;;  %v3353_v9 = vpop.eup %3352 }
 0x240   : > { %v3355_v34 = vpop.eup %3354 }
 0x241   : > { %v2136_v37 = vadd.f32 %v2135_v11, %v2134_v38  ;;  %v2237_v43 = vadd.f32 %v3347_v48, %v2236_v2  ;;  %v2171_v29 = vmul.f32 %v3355_v34, %v2167_v52 }
 0x243   : > { %v2137_v49 = vrot.slane %v2136_v37, 2  ;;  %v2238_v24 = vadd.f32 %v3349_v50, %v2237_v43 }
 0x245   : > { %v2138_v21 = vadd.f32 %v2137_v49, %v2136_v37  ;;  %v2239_v51 = vadd.f32 %v3351_v33, %v2238_v24 }
 0x247   : > { %v2139_v15 = vrot.slane %v2138_v21, 1  ;;  %v2240_v1 = vadd.f32 %v3353_v9, %v2239_v51 }
 0x249   : > { %v2140_v18 = vadd.f32 %v2139_v15, %v2138_v21  ;;  %v2241_v27 = vrot.slane %v2240_v1, 4 }
 0x24b   : > { %v2141_v28 = vadd.f32 %v2140_v18, %v2065_v32  ;;  %v2242_v46 = vadd.f32 %v2241_v27, %v2240_v1 }
 0x24d   : > { %2142 = vst [vmem:[#allocation3] sm:$0x1] %v2141_v28  ;;  %v2243_v30 = vrot.slane %v2242_v46, 2 }
 0x24f   : > { %v2244_v31 = vadd.f32 %v2243_v30, %v2242_v46 }
 0x251   : > { %v2245_v44 = vrot.slane %v2244_v31, 1  ;;  %2253 = sbr.rel (%p2407_p2) target bundleno = 623 (0x26f), region = 48 }
 0x253   : > { %v2246_v3 = vadd.f32 %v2245_v44, %v2244_v31 }
 0x254   : > { %v2255_v57 = vld [vmem:[#allocation3] sm:$0x1] (!%p2407_p2) }
 0x255   : > { %v2247_v23 = vadd.f32 %v2246_v3, %v2171_v29  ;;  %3356 = vlog2.f32 (!%p2407_p2), %v2255_v57 }
 0x257   : > { %2248 = vst [vmem:[#allocation5] sm:$0x1] %v2247_v23 }
 0x25e   : > { %v2261_v42 = vld [vmem:[#allocation5] sm:$0x1] }
 0x25f   : > { %3358 = vlog2.f32 %v2261_v42  ;;  %v3357_v6 = vpop.eup %3356 }
 0x260   : > { %v2257_v19 = vmul.f32 0.6931472, %v3357_v6 }
 0x262   : > { %v2258_v47 = vadd.f32 %v2257_v19, %v2254_v13 }
 0x264   : > { %v2260_v26 = vadd.f32 %v2259_v45, %v2258_v47 }
 0x269   : > { %v3359_v40 = vpop.eup %3358 }
 0x26a   : > { %v2263_v61 = vmul.f32 0.6931472, %v3359_v40 }
 0x26c   : > { %v2264_v4 = vadd.f32 %v2263_v61, %v2260_v26 }
 0x26e   : > { %2265 = vst [vmem:[%s3597_s9] sm:$0x1] %v2264_v4 }
 0x26f PF: > { %s5047_s10 = scalar_lea.hbm %s5102_s5, %s3562_s11  ;;  %s2279_s17 = sshll.u32 %s3597_s9, 4  ;;  %s2280_s17 = int_to_ptr.vmem [resolvable:$true] %s2279_s17 }
 0x270   : > { %s5390_s26 = sand.u32 1, %s3430_s19   ;;  %s3360_s7 = scalar_lea.vmem %s2280_s17, 16 }
 0x271   : > { %s2267_s27 = scalar_lea.sflag [#allocation7], %s5390_s26  ;;  %p3361_p4 = scmp.ne.s32.totalorder %s2280_s17, %s3360_s7 }
 0x272   : > { %s3460_s8 = smov [#allocation6]  }
 0x273   : > { %p3362_p5 = pnand %p3361_p4, %p3540_p3  ;;  %s3364_s13 = sshll.u32 %s3460_s8, 4  ;;  %s3365_s13 = int_to_ptr.vmem [resolvable:$false] %s3364_s13 }
 0x274   : > { %s3366_s15 = scalar_lea.vmem %s3365_s13, 32  ;;  %p3367_p7 = scmp.lt.s32.totalorder %s2280_s17, %s3365_s13 }
 0x275   : > { %p3363_p6 = pneg %p3362_p5  ;;  %p3368_p8 = scmp.lt.s32.totalorder %s3366_s15, %s3360_s7 }
 0x277   : > { %p3369_p10 = por %p3368_p8, %p3367_p7 }
 0x279   : > { %p3370_p11 = pnand %p3369_p10, %p3363_p6 }
 0x27b   : > { %3373 = shalt.err (!%p3370_p11)
}
 0x27c   : > { %s3374_s9 = scalar_lea.hbm %s5047_s10, 16  ;;  %s3378_s16 = scalar_lea.hbm %s5102_s5, 32 }
 0x27d   : > { %p3375_p12 = scmp.ne.s32.totalorder %s5047_s10, %s3374_s9  ;;  %p3379_p1 = scmp.lt.u32.totalorder %s5047_s10, %s5102_s5 }
 0x27e   : > { %p3380_p2 = scmp.lt.u32.totalorder %s3378_s16, %s3374_s9  ;;  %p3382_p5 = scmp.lt.u32.totalorder %s3374_s9, %s5047_s10 }
 0x27f   : > { %p3376_p13 = pnand %p3375_p12, %p3540_p3 }
 0x280   : > { %p3381_p4 = por %p3380_p2, %p3379_p1 }
 0x281   : > { %p3377_p0 = pneg %p3376_p13 }
 0x282   : > { %p3383_p6 = por %p3382_p5, %p3381_p4 }
 0x284   : > { %p3384_p7 = pnand %p3383_p6, %p3377_p0 }
 0x286   : > { %3387 = shalt.err (!%p3384_p7)
}
 0x287   : > { %3211 = dma.vmem_to_hbm [thread:$0]  (%p3540_p3), %s2280_s17, 16, %s5047_s10, %s2267_s27  }
 0x288 PF: > { %p3217_p8 = scmp.ge.s32.totalorder %s3454_s25, 2  ;;  %s2291_s23 = sand.u32 1, %s3426_s18  }
 0x289   : > { %s2292_s28 = scalar_lea.sflag [#allocation7], %s2291_s23 }
 0x28a   : > { %p3214_p10 = pnand %p3217_p8, %p3550_p9 }
 0x28c   : > { %3421 = dma.done.wait (!%p3214_p10), %s2292_s28, 16  }
 0x28d   : > { %3423 = vsyncadd (!%p3214_p10), %s2292_s28, 4294967280  ;;  %s18_s25 = sadd.s32 1, %s3454_s25   ;;  %s5391_s22 = sld [smem:[#allocation13_spill]] }
 0x28e   : > { %p15_p11 = scmp.ge.s32.totalorder %s18_s25, 6   ;;  %s5392_s21 = sld [smem:[#allocation9_spill]] }
 0x28f   : > { %s5393_s30 = sld [smem:[#allocation10_spill]]  ;;  %s5394_s23 = sld [smem:[#allocation11_spill]] }
 0x290   : > { %s5395_s24 = sld [smem:[#allocation12_spill]]  ;;  %s5396_s18 = smov %s3430_s19 }
 0x291   : > { %s5397_s19 = smov %s3434_s20  ;;  %17 = sbr.rel (!%p15_p11) target bundleno = 7 (0x7), region = 95 }
 0x293   : > { %s5398_s20 = smov %s5391_s22 }
 0x295   : > { %s5399_s22 = smov %s5393_s30 }
 0x298   :  { %2296 = vsyncpa [#allocation7], 1 }
 0x299   :  { %2298 = vsyncpa [#allocation7 + $0x1], 1 }

</bundles_post_ra>
